<compile_context>
chip_gen: v7x
topology: tpu7x:2x2x1
jax: 0.10.0
libtpu: 0.0.40
codegen_flags: <defaults>
</compile_context>

<pallas_src>
import functools

import jax
import jax.numpy as jnp
from jax.experimental import pallas as pl
from jax.experimental.pallas import tpu as pltpu


D_LANE = 128                    # feature dim padded to one full lane width
ALIGN = 256                     # node-count padding granularity
MAX_TILE = 1024                 # max rows/cols of one A tile
VMEM_LIMIT = 48 * 1024 * 1024   # explicit scoped-VMEM budget (< v7x 64 MiB)


def _round_up(n, m):
    return (n + m - 1) // m * m


def _pick_tile(n_pad):
    """Largest multiple-of-ALIGN tile <= MAX_TILE dividing n_pad that leaves
    >= 2 row blocks when possible (so the 'parallel' axis feeds both v7x TCs)."""
    best = None
    for t in range(ALIGN, min(MAX_TILE, n_pad) + 1, ALIGN):
        if n_pad % t == 0 and n_pad // t >= 2:
            best = t
    return best if best is not None else n_pad


# ---------------------------------------------------------------------------
# Kernel 1: row-wise L2 normalization (F.normalize, p=2, dim=1, eps=1e-12).
# Emits the f32 copy (residual path) and a bf16 copy (MXU operand).
# ---------------------------------------------------------------------------
def normalize_kernel(x_ref, xn_ref, xnb_ref):
    x = x_ref[...]
    sq = jnp.sum(x * x, axis=1, keepdims=True)
    # 1 / max(||x||, 1e-12) == rsqrt(max(||x||^2, 1e-24))   (EUP, not VALU div)
    inv = jax.lax.rsqrt(jnp.maximum(sq, 1e-24))
    xn = x * inv
    xn_ref[...] = xn
    xnb_ref[...] = xn.astype(jnp.bfloat16)


def _normalize(x_pad, tm):
    n_pad, d_pad = x_pad.shape
    return pl.pallas_call(
        normalize_kernel,
        out_shape=(jax.ShapeDtypeStruct((n_pad, d_pad), jnp.float32),
                   jax.ShapeDtypeStruct((n_pad, d_pad), jnp.bfloat16)),
        grid_spec=pltpu.PrefetchScalarGridSpec(
            num_scalar_prefetch=0,
            grid=(n_pad // tm,),
            in_specs=[pl.BlockSpec((tm, d_pad), lambda i: (i, 0))],
            out_specs=(pl.BlockSpec((tm, d_pad), lambda i: (i, 0)),
                       pl.BlockSpec((tm, d_pad), lambda i: (i, 0)))),
        compiler_params=pltpu.CompilerParams(
            dimension_semantics=("parallel",),
            vmem_limit_bytes=VMEM_LIMIT),
    )(x_pad)


# ---------------------------------------------------------------------------
# Kernel 2: one propagation pass  h_out = leaky_relu((A @ h_in) * inv_deg)
# Accumulates directly into the k-resident f32 output block; also emits the
# bf16 copy of the result (MXU operand for the next layer).
# ---------------------------------------------------------------------------
def prop_kernel(a_ref, hb_ref, inv_ref, o_ref, ob_ref):
    k = pl.program_id(1)

    @pl.when(k == 0)
    def _():
        o_ref[...] = jnp.zeros_like(o_ref)

    o_ref[...] += jnp.dot(a_ref[...], hb_ref[...],
                          preferred_element_type=jnp.float32)

    @pl.when(k == pl.num_programs(1) - 1)
    def _():
        h = o_ref[...] * inv_ref[...]          # 1/deg fold (ones for 'add')
        h = jnp.where(h > 0, h, 0.01 * h)      # leaky_relu
        o_ref[...] = h
        ob_ref[...] = h.astype(jnp.bfloat16)


# ---------------------------------------------------------------------------
# Kernel 3: second pass with the residual sum fused into the final store:
#   out = xn + h1 + leaky_relu((A @ h1) * inv_deg)
# ---------------------------------------------------------------------------
def prop_residual_kernel(a_ref, hb_ref, inv_ref, xn_ref, h1_ref, o_ref):
    k = pl.program_id(1)

    @pl.when(k == 0)
    def _():
        o_ref[...] = jnp.zeros_like(o_ref)

    o_ref[...] += jnp.dot(a_ref[...], hb_ref[...],
                          preferred_element_type=jnp.float32)

    @pl.when(k == pl.num_programs(1) - 1)
    def _():
        h2 = o_ref[...] * inv_ref[...]
        h2 = jnp.where(h2 > 0, h2, 0.01 * h2)
        o_ref[...] = xn_ref[...] + h1_ref[...] + h2


def _propagate(adj_bf16, h_bf16, inv_deg, residuals=None, *, tm, tk):
    rows_pad, cols_pad = adj_bf16.shape
    d_pad = h_bf16.shape[1]
    grid = (rows_pad // tm, cols_pad // tk)

    in_specs = [
        pl.BlockSpec((tm, tk), lambda i, k: (i, k)),      # A tile (bf16)
        pl.BlockSpec((tk, d_pad), lambda i, k: (k, 0)),   # h tile (bf16)
        pl.BlockSpec((tm, 1), lambda i, k: (i, 0)),       # 1/deg per row block
    ]
    args = (adj_bf16, h_bf16, inv_deg)

    if residuals is None:
        kernel = prop_kernel
        out_shape = (jax.ShapeDtypeStruct((rows_pad, d_pad), jnp.float32),
                     jax.ShapeDtypeStruct((rows_pad, d_pad), jnp.bfloat16))
        out_specs = (pl.BlockSpec((tm, d_pad), lambda i, k: (i, 0)),
                     pl.BlockSpec((tm, d_pad), lambda i, k: (i, 0)))
    else:
        kernel = prop_residual_kernel
        # residual row blocks: block index constant across k -> fetched once per i
        in_specs += [pl.BlockSpec((tm, d_pad), lambda i, k: (i, 0)),
                     pl.BlockSpec((tm, d_pad), lambda i, k: (i, 0))]
        args = args + residuals
        out_shape = jax.ShapeDtypeStruct((rows_pad, d_pad), jnp.float32)
        out_specs = pl.BlockSpec((tm, d_pad), lambda i, k: (i, 0))

    # TODO(synk): pipeline_mode=pl.Buffered(1) on the k-invariant operands and a
    # per-row-scaled int8/fp8 A stream would shave the remaining HBM bytes.
    return pl.pallas_call(
        kernel,
        out_shape=out_shape,
        grid_spec=pltpu.PrefetchScalarGridSpec(
            num_scalar_prefetch=0,
            grid=grid,
            in_specs=in_specs,
            out_specs=out_specs),
        compiler_params=pltpu.CompilerParams(
            dimension_semantics=("parallel", "arbitrary"),
            vmem_limit_bytes=VMEM_LIMIT),
    )(*args)


# ---------------------------------------------------------------------------
# Glue: bipartite weighted adjacency blocks from edge_index / weight_vector,
# built directly into the padded buffers and cast once to bf16.
# ---------------------------------------------------------------------------
def build_bipartite_adjacency(edge_index, weight_vector, num_user, num_item,
                              u_pad, i_pad, aggr_mode):
    """edge_index: (2, E) int32 (undoubled); weight_vector: (2E, 1) float32
    matching the doubled edge list [edges ; reversed edges] as in EGCN.forward.

    Returns (A_ui, A_iu, inv_deg_u, inv_deg_i) with
      A_ui[u, i'] = sum of weights on (item i'+num_user) -> (user u) messages
      A_iu[i', u] = sum of weights on (user u) -> (item i'+num_user) messages
    """
    ei = jnp.concatenate([edge_index, edge_index[::-1]], axis=1)   # (2, 2E)
    src = ei[0]   # j  (message source, x_j)
    dst = ei[1]   # i  (aggregation target)
    w = weight_vector.reshape(-1).astype(jnp.float32)              # (2E,)

    src_is_user = src < num_user
    dst_is_user = dst < num_user
    # TODO(synk): non-bipartite (user-user / item-item) edges are dropped here;
    # GRCN's edge_index is strictly user-item so none exist in practice.
    m_ui = jnp.logical_and(dst_is_user, jnp.logical_not(src_is_user))
    m_iu = jnp.logical_and(jnp.logical_not(dst_is_user), src_is_user)

    r_ui = jnp.where(m_ui, dst, 0)
    c_ui = jnp.where(m_ui, src - num_user, 0)
    r_iu = jnp.where(m_iu, dst - num_user, 0)
    c_iu = jnp.where(m_iu, src, 0)

    a_ui = jnp.zeros((u_pad, i_pad), jnp.float32).at[r_ui, c_ui].add(
        jnp.where(m_ui, w, 0.0))
    a_iu = jnp.zeros((i_pad, u_pad), jnp.float32).at[r_iu, c_iu].add(
        jnp.where(m_iu, w, 0.0))

    if aggr_mode == "mean":
        deg_u = jnp.zeros((u_pad,), jnp.float32).at[r_ui].add(
            m_ui.astype(jnp.float32))
        deg_i = jnp.zeros((i_pad,), jnp.float32).at[r_iu].add(
            m_iu.astype(jnp.float32))
        inv_u = 1.0 / jnp.maximum(deg_u, 1.0)
        inv_i = 1.0 / jnp.maximum(deg_i, 1.0)
    elif aggr_mode == "add":
        inv_u = jnp.ones((u_pad,), jnp.float32)
        inv_i = jnp.ones((i_pad,), jnp.float32)
    else:
        # TODO(synk): 'max' aggregation is not expressible as a matmul.
        raise NotImplementedError(aggr_mode)

    # TODO(synk): for production-scale graphs replace these dense O(|U|*|I|)
    # blocks with a CSR scalar-prefetch sparse gather kernel.
    return (a_ui.astype(jnp.bfloat16), a_iu.astype(jnp.bfloat16),
            inv_u[:, None], inv_i[:, None])


def egcn_forward(a_ui, a_iu, inv_u, inv_i, x, num_user, num_item, dim_e,
                 tile_u, tile_i):
    u_pad, i_pad = a_ui.shape
    d_pad = _round_up(dim_e, D_LANE)

    x_u = jnp.zeros((u_pad, d_pad), jnp.float32).at[
        :num_user, :dim_e].set(x[:num_user])
    x_i = jnp.zeros((i_pad, d_pad), jnp.float32).at[
        :num_item, :dim_e].set(x[num_user:])

    xn_u, xnb_u = _normalize(x_u, tile_u)                 # F.normalize
    xn_i, xnb_i = _normalize(x_i, tile_i)

    # conv 1: users aggregate from items and vice versa (bipartite blocks only)
    h1_u, h1b_u = _propagate(a_ui, xnb_i, inv_u, tm=tile_u, tk=tile_i)
    h1_i, h1b_i = _propagate(a_iu, xnb_u, inv_i, tm=tile_i, tk=tile_u)

    # conv 2 with the xn + h1 + h2 residual fused into the final store
    out_u = _propagate(a_ui, h1b_i, inv_u, residuals=(xn_u, h1_u),
                       tm=tile_u, tk=tile_i)
    out_i = _propagate(a_iu, h1b_u, inv_i, residuals=(xn_i, h1_i),
                       tm=tile_i, tk=tile_u)

    return jnp.concatenate([out_u[:num_user, :dim_e],
                            out_i[:num_item, :dim_e]], axis=0)


@functools.partial(jax.jit,
                   static_argnames=("num_user", "num_item", "dim_e", "aggr_mode"))
def egcn_apply(edge_index, weight_vector, id_embedding, *,
               num_user, num_item, dim_e, aggr_mode):
    u_pad = _round_up(num_user, ALIGN)
    i_pad = _round_up(num_item, ALIGN)
    tile_u = _pick_tile(u_pad)
    tile_i = _pick_tile(i_pad)
    a_ui, a_iu, inv_u, inv_i = build_bipartite_adjacency(
        edge_index, weight_vector, num_user, num_item, u_pad, i_pad, aggr_mode)
    return egcn_forward(a_ui, a_iu, inv_u, inv_i, id_embedding,
                        num_user, num_item, dim_e, tile_u, tile_i)


class EGCNPallas:
    def __init__(self, num_user, num_item, dim_E, aggr_mode, key):
        self.num_user = num_user
        self.num_item = num_item
        self.dim_E = dim_E
        self.aggr_mode = aggr_mode
        n = num_user + num_item
        # xavier_normal_: std = sqrt(2 / (fan_in + fan_out)) for an (n, dim_E) matrix
        std = (2.0 / (n + dim_E)) ** 0.5
        self.id_embedding = std * jax.random.normal(key, (n, dim_E), jnp.float32)

    def __call__(self, edge_index, weight_vector):
        return egcn_apply(edge_index, weight_vector, self.id_embedding,
                          num_user=self.num_user, num_item=self.num_item,
                          dim_e=self.dim_E, aggr_mode=self.aggr_mode)


# ---------------------------------------------------------------------------
# Pure-JAX references for sanity checking.
# ---------------------------------------------------------------------------
def build_dense_adjacency_ref(edge_index, weight_vector, num_nodes, aggr_mode):
    ei = jnp.concatenate([edge_index, edge_index[::-1]], axis=1)
    src, dst = ei[0], ei[1]
    w = weight_vector.reshape(-1).astype(jnp.float32)
    adj = jnp.zeros((num_nodes, num_nodes), jnp.float32).at[dst, src].add(w)
    if aggr_mode == "mean":
        deg = jnp.zeros((num_nodes,), jnp.float32).at[dst].add(1.0)
        inv = 1.0 / jnp.maximum(deg, 1.0)
    else:
        inv = jnp.ones((num_nodes,), jnp.float32)
    return adj, inv[:, None]


def _lrelu(x):
    return jnp.where(x > 0, x, 0.01 * x)


def egcn_ref_f32(adj, inv_deg, x):
    xn = x / jnp.maximum(jnp.linalg.norm(x, axis=1, keepdims=True), 1e-12)
    h1 = _lrelu((adj @ xn) * inv_deg)
    h2 = _lrelu((adj @ h1) * inv_deg)
    return xn + h1 + h2


def egcn_ref_bf16(adj, inv_deg, x):
    """Mirrors the kernel's bf16 MXU operands / f32 accumulation."""
    adj_b = adj.astype(jnp.bfloat16)
    xn = x / jnp.maximum(jnp.linalg.norm(x, axis=1, keepdims=True), 1e-12)
    h1 = _lrelu(jnp.dot(adj_b, xn.astype(jnp.bfloat16),
                        preferred_element_type=jnp.float32) * inv_deg)
    h2 = _lrelu(jnp.dot(adj_b, h1.astype(jnp.bfloat16),
                        preferred_element_type=jnp.float32) * inv_deg)
    return xn + h1 + h2


if __name__ == "__main__":
    key = jax.random.PRNGKey(0)
    k_emb, k_src, k_dst, k_w = jax.random.split(key, 4)

    num_user, num_item, dim_E = 12, 20, 32
    num_edges = 40
    n_nodes = num_user + num_item

    # Bipartite user->item edges (as in GRCN), plus per-(doubled)-edge weights.
    src = jax.random.randint(k_src, (num_edges,), 0, num_user)
    dst = jax.random.randint(k_dst, (num_edges,), num_user, n_nodes)
    edge_index = jnp.stack([src, dst]).astype(jnp.int32)             # (2, E)
    weight_vector = jax.random.uniform(k_w, (2 * num_edges, 1), jnp.float32)

    for aggr_mode in ("add", "mean"):
        model = EGCNPallas(num_user, num_item, dim_E, aggr_mode, k_emb)
        out = model(edge_index, weight_vector)
        jax.block_until_ready(out)
        assert out.shape == (n_nodes, dim_E)

        adj, inv_deg = build_dense_adjacency_ref(
            edge_index, weight_vector, n_nodes, aggr_mode)
        ref_b = egcn_ref_bf16(adj, inv_deg, model.id_embedding)  # bf16 rounding
        ref_f = egcn_ref_f32(adj, inv_deg, model.id_embedding)   # full-f32 torch
        assert jnp.allclose(out, ref_b, atol=1e-3, rtol=1e-3), \
            (aggr_mode, float(jnp.max(jnp.abs(out - ref_b))))
        assert jnp.allclose(out, ref_f, atol=3e-2, rtol=3e-2), \
            (aggr_mode, float(jnp.max(jnp.abs(out - ref_f))))

    print("KERNEL_OK")
</pallas_src>

<mosaic_0001>
module attributes {stable_mosaic.version = 11 : i64} {
  func.func private @main(%arg0: i32) attributes {dimension_semantics = [#tpu.dimension_semantics<core_parallel>], iteration_bounds = array<i64: 2>, tpu.core_type = #tpu.core_type<sc_scalar_subcore>, window_params = []} {
    return
  }
}

module attributes {stable_mosaic.version = 11 : i64} {
  func.func private @main(%arg0: i32) attributes {dimension_semantics = [#tpu.dimension_semantics<core_parallel>], iteration_bounds = array<i64: 2>, tpu.core_type = #tpu.core_type<sc_scalar_subcore>, window_params = []} {
    return
  }
}

module attributes {stable_mosaic.version = 11 : i64} {
  func.func @prop_kernel(%arg0: i32, %arg1: i32, %arg2: memref<256x256xbf16, #tpu.memory_space<vmem>>, %arg3: memref<256x128xbf16, #tpu.memory_space<vmem>>, %arg4: memref<256x1xf32, #tpu.memory_space<vmem>>, %arg5: memref<256x128xf32, #tpu.memory_space<vmem>>, %arg6: memref<256x128xbf16, #tpu.memory_space<vmem>>) attributes {dimension_semantics = [#tpu.dimension_semantics<parallel>, #tpu.dimension_semantics<arbitrary>], iteration_bounds = array<i64: 1, 1>, scalar_prefetch = 0 : i64, scratch_operands = 0 : i64, tpu.core_type = #tpu.core_type<tc>, window_params = [{transform_indices = @transform_0, window_bounds = array<i64: 256, 256>}, {transform_indices = @transform_1, window_bounds = array<i64: 256, 128>}, {transform_indices = @transform_2, window_bounds = array<i64: 256, 1>}, {transform_indices = @transform_3, window_bounds = array<i64: 256, 128>}, {transform_indices = @transform_4, window_bounds = array<i64: 256, 128>}]} {
    %c0_i32 = arith.constant 0 : i32
    %0 = arith.cmpi eq, %arg1, %c0_i32 : i32
    %1 = arith.extui %0 : i1 to i32
    %c0_i32_0 = arith.constant 0 : i32
    %2 = arith.cmpi ne, %1, %c0_i32_0 : i32
    scf.if %2 {
      %cst_10 = arith.constant 0.000000e+00 : f32
      %12 = vector.broadcast %cst_10 : f32 to vector<256x128xf32>
      %c0_11 = arith.constant 0 : index
      %c0_12 = arith.constant 0 : index
      %13 = vector.load %arg5[%c0_11, %c0_12] : memref<256x128xf32, #tpu.memory_space<vmem>>, vector<256x128xf32>
      tpu.vector_store %arg5[%c0_11, %c0_12], %12 {strides = array<i32>} : memref<256x128xf32, #tpu.memory_space<vmem>>, vector<256x128xf32>,
    } else {
    }
    %c0 = arith.constant 0 : index
    %c0_1 = arith.constant 0 : index
    %3 = vector.load %arg5[%c0, %c0_1] : memref<256x128xf32, #tpu.memory_space<vmem>>, vector<256x128xf32>
    %c0_2 = arith.constant 0 : index
    %c0_3 = arith.constant 0 : index
    %4 = vector.load %arg2[%c0_2, %c0_3] : memref<256x256xbf16, #tpu.memory_space<vmem>>, vector<256x256xbf16>
    %c0_4 = arith.constant 0 : index
    %c0_5 = arith.constant 0 : index
    %5 = vector.load %arg3[%c0_4, %c0_5] : memref<256x128xbf16, #tpu.memory_space<vmem>>, vector<256x128xbf16>
    %cst = arith.constant dense<0.000000e+00> : vector<256x128xf32>
    %6 = tpu.matmul %4, %5, %cst {dimension_numbers = #tpu.dot_dimension_numbers<[1], [0], [0], [1], [0, 0, 1, 1], [], []>} : vector<256x256xbf16>, vector<256x128xbf16>, vector<256x128xf32> -> vector<256x128xf32>
    %7 = arith.addf %3, %6 : vector<256x128xf32>
    %c0_6 = arith.constant 0 : index
    %c0_7 = arith.constant 0 : index
    %8 = vector.load %arg5[%c0_6, %c0_7] : memref<256x128xf32, #tpu.memory_space<vmem>>, vector<256x128xf32>
    tpu.vector_store %arg5[%c0_6, %c0_7], %7 {strides = array<i32>} : memref<256x128xf32, #tpu.memory_space<vmem>>, vector<256x128xf32>,
    %c0_i32_8 = arith.constant 0 : i32
    %9 = arith.cmpi eq, %arg1, %c0_i32_8 : i32
    %10 = arith.extui %9 : i1 to i32
    %c0_i32_9 = arith.constant 0 : i32
    %11 = arith.cmpi ne, %10, %c0_i32_9 : i32
    scf.if %11 {
      %c0_10 = arith.constant 0 : index
      %c0_11 = arith.constant 0 : index
      %12 = vector.load %arg5[%c0_10, %c0_11] : memref<256x128xf32, #tpu.memory_space<vmem>>, vector<256x128xf32>
      %c0_12 = arith.constant 0 : index
      %c0_13 = arith.constant 0 : index
      %13 = vector.load %arg4[%c0_12, %c0_13] : memref<256x1xf32, #tpu.memory_space<vmem>>, vector<256x1xf32>
      %14 = vector.broadcast %13 : vector<256x1xf32> to vector<256x128xf32>
      %15 = arith.mulf %12, %14 : vector<256x128xf32>
      %cst_14 = arith.constant 0.000000e+00 : f32
      %16 = vector.broadcast %cst_14 : f32 to vector<256x128xf32>
      %17 = arith.cmpf ogt, %15, %16 : vector<256x128xf32>
      %cst_15 = arith.constant 0.00999999977 : f32
      %18 = vector.broadcast %cst_15 : f32 to vector<256x128xf32>
      %19 = arith.mulf %18, %15 : vector<256x128xf32>
      %20 = arith.select %17, %15, %19 : vector<256x128xi1>, vector<256x128xf32>
      %c0_16 = arith.constant 0 : index
      %c0_17 = arith.constant 0 : index
      %21 = vector.load %arg5[%c0_16, %c0_17] : memref<256x128xf32, #tpu.memory_space<vmem>>, vector<256x128xf32>
      tpu.vector_store %arg5[%c0_16, %c0_17], %20 {strides = array<i32>} : memref<256x128xf32, #tpu.memory_space<vmem>>, vector<256x128xf32>,
      %22 = arith.truncf %20 : vector<256x128xf32> to vector<256x128xbf16>
      %c0_18 = arith.constant 0 : index
      %c0_19 = arith.constant 0 : index
      %23 = vector.load %arg6[%c0_18, %c0_19] : memref<256x128xbf16, #tpu.memory_space<vmem>>, vector<256x128xbf16>
      tpu.vector_store %arg6[%c0_18, %c0_19], %22 {strides = array<i32>} : memref<256x128xbf16, #tpu.memory_space<vmem>>, vector<256x128xbf16>,
    } else {
    }
    return
  }
  func.func @transform_0(%arg0: i32, %arg1: i32) -> (i32, i32) {
    %c0_i32 = arith.constant 0 : i32
    return %arg0, %arg1 : i32, i32
  }
  func.func @transform_1(%arg0: i32, %arg1: i32) -> (i32, i32) {
    %c0_i32 = arith.constant 0 : i32
    %c0_i32_0 = arith.constant 0 : i32
    return %arg1, %c0_i32 : i32, i32
  }
  func.func @transform_2(%arg0: i32, %arg1: i32) -> (i32, i32) {
    %c0_i32 = arith.constant 0 : i32
    %c0_i32_0 = arith.constant 0 : i32
    return %arg0, %c0_i32 : i32, i32
  }
  func.func @transform_3(%arg0: i32, %arg1: i32) -> (i32, i32) {
    %c0_i32 = arith.constant 0 : i32
    %c0_i32_0 = arith.constant 0 : i32
    return %arg0, %c0_i32 : i32, i32
  }
  func.func @transform_4(%arg0: i32, %arg1: i32) -> (i32, i32) {
    %c0_i32 = arith.constant 0 : i32
    %c0_i32_0 = arith.constant 0 : i32
    return %arg0, %c0_i32 : i32, i32
  }
}

module attributes {stable_mosaic.version = 11 : i64} {
  func.func @normalize_kernel(%arg0: i32, %arg1: memref<256x128xf32, #tpu.memory_space<vmem>>, %arg2: memref<256x128xf32, #tpu.memory_space<vmem>>, %arg3: memref<256x128xbf16, #tpu.memory_space<vmem>>) attributes {dimension_semantics = [#tpu.dimension_semantics<parallel>], iteration_bounds = array<i64: 1>, scalar_prefetch = 0 : i64, scratch_operands = 0 : i64, tpu.core_type = #tpu.core_type<tc>, window_params = [{transform_indices = @transform_0, window_bounds = array<i64: 256, 128>}, {transform_indices = @transform_1, window_bounds = array<i64: 256, 128>}, {transform_indices = @transform_2, window_bounds = array<i64: 256, 128>}]} {
    %c0 = arith.constant 0 : index
    %c0_0 = arith.constant 0 : index
    %0 = vector.load %arg1[%c0, %c0_0] : memref<256x128xf32, #tpu.memory_space<vmem>>, vector<256x128xf32>
    %1 = arith.mulf %0, %0 : vector<256x128xf32>
    %cst = arith.constant dense<0.000000e+00> : vector<256xf32>
    %2 = vector.multi_reduction <add>, %1, %cst [1] : vector<256x128xf32> to vector<256xf32>
    %3 = vector.shape_cast %2 : vector<256xf32> to vector<256x1xf32>
    %cst_1 = arith.constant 1.000000e-24 : f32
    %4 = vector.broadcast %cst_1 : f32 to vector<256x1xf32>
    %5 = arith.maximumf %3, %4 : vector<256x1xf32>
    %6 = math.rsqrt %5 : vector<256x1xf32>
    %7 = vector.broadcast %6 : vector<256x1xf32> to vector<256x128xf32>
    %8 = arith.mulf %0, %7 : vector<256x128xf32>
    %c0_2 = arith.constant 0 : index
    %c0_3 = arith.constant 0 : index
    %9 = vector.load %arg2[%c0_2, %c0_3] : memref<256x128xf32, #tpu.memory_space<vmem>>, vector<256x128xf32>
    tpu.vector_store %arg2[%c0_2, %c0_3], %8 {strides = array<i32>} : memref<256x128xf32, #tpu.memory_space<vmem>>, vector<256x128xf32>,
    %10 = arith.truncf %8 : vector<256x128xf32> to vector<256x128xbf16>
    %c0_4 = arith.constant 0 : index
    %c0_5 = arith.constant 0 : index
    %11 = vector.load %arg3[%c0_4, %c0_5] : memref<256x128xbf16, #tpu.memory_space<vmem>>, vector<256x128xbf16>
    tpu.vector_store %arg3[%c0_4, %c0_5], %10 {strides = array<i32>} : memref<256x128xbf16, #tpu.memory_space<vmem>>, vector<256x128xbf16>,
    return
  }
  func.func @transform_0(%arg0: i32) -> (i32, i32) {
    %c0_i32 = arith.constant 0 : i32
    %c0_i32_0 = arith.constant 0 : i32
    return %arg0, %c0_i32 : i32, i32
  }
  func.func @transform_1(%arg0: i32) -> (i32, i32) {
    %c0_i32 = arith.constant 0 : i32
    %c0_i32_0 = arith.constant 0 : i32
    return %arg0, %c0_i32 : i32, i32
  }
  func.func @transform_2(%arg0: i32) -> (i32, i32) {
    %c0_i32 = arith.constant 0 : i32
    %c0_i32_0 = arith.constant 0 : i32
    return %arg0, %c0_i32 : i32, i32
  }
}

module attributes {stable_mosaic.version = 11 : i64} {
  func.func @prop_residual_kernel(%arg0: i32, %arg1: i32, %arg2: memref<256x256xbf16, #tpu.memory_space<vmem>>, %arg3: memref<256x128xbf16, #tpu.memory_space<vmem>>, %arg4: memref<256x1xf32, #tpu.memory_space<vmem>>, %arg5: memref<256x128xf32, #tpu.memory_space<vmem>>, %arg6: memref<256x128xf32, #tpu.memory_space<vmem>>, %arg7: memref<256x128xf32, #tpu.memory_space<vmem>>) attributes {dimension_semantics = [#tpu.dimension_semantics<parallel>, #tpu.dimension_semantics<arbitrary>], iteration_bounds = array<i64: 1, 1>, scalar_prefetch = 0 : i64, scratch_operands = 0 : i64, tpu.core_type = #tpu.core_type<tc>, window_params = [{transform_indices = @transform_0, window_bounds = array<i64: 256, 256>}, {transform_indices = @transform_1, window_bounds = array<i64: 256, 128>}, {transform_indices = @transform_2, window_bounds = array<i64: 256, 1>}, {transform_indices = @transform_3, window_bounds = array<i64: 256, 128>}, {transform_indices = @transform_4, window_bounds = array<i64: 256, 128>}, {transform_indices = @transform_5, window_bounds = array<i64: 256, 128>}]} {
    %c0_i32 = arith.constant 0 : i32
    %0 = arith.cmpi eq, %arg1, %c0_i32 : i32
    %1 = arith.extui %0 : i1 to i32
    %c0_i32_0 = arith.constant 0 : i32
    %2 = arith.cmpi ne, %1, %c0_i32_0 : i32
    scf.if %2 {
      %cst_10 = arith.constant 0.000000e+00 : f32
      %12 = vector.broadcast %cst_10 : f32 to vector<256x128xf32>
      %c0_11 = arith.constant 0 : index
      %c0_12 = arith.constant 0 : index
      %13 = vector.load %arg7[%c0_11, %c0_12] : memref<256x128xf32, #tpu.memory_space<vmem>>, vector<256x128xf32>
      tpu.vector_store %arg7[%c0_11, %c0_12], %12 {strides = array<i32>} : memref<256x128xf32, #tpu.memory_space<vmem>>, vector<256x128xf32>,
    } else {
    }
    %c0 = arith.constant 0 : index
    %c0_1 = arith.constant 0 : index
    %3 = vector.load %arg7[%c0, %c0_1] : memref<256x128xf32, #tpu.memory_space<vmem>>, vector<256x128xf32>
    %c0_2 = arith.constant 0 : index
    %c0_3 = arith.constant 0 : index
    %4 = vector.load %arg2[%c0_2, %c0_3] : memref<256x256xbf16, #tpu.memory_space<vmem>>, vector<256x256xbf16>
    %c0_4 = arith.constant 0 : index
    %c0_5 = arith.constant 0 : index
    %5 = vector.load %arg3[%c0_4, %c0_5] : memref<256x128xbf16, #tpu.memory_space<vmem>>, vector<256x128xbf16>
    %cst = arith.constant dense<0.000000e+00> : vector<256x128xf32>
    %6 = tpu.matmul %4, %5, %cst {dimension_numbers = #tpu.dot_dimension_numbers<[1], [0], [0], [1], [0, 0, 1, 1], [], []>} : vector<256x256xbf16>, vector<256x128xbf16>, vector<256x128xf32> -> vector<256x128xf32>
    %7 = arith.addf %3, %6 : vector<256x128xf32>
    %c0_6 = arith.constant 0 : index
    %c0_7 = arith.constant 0 : index
    %8 = vector.load %arg7[%c0_6, %c0_7] : memref<256x128xf32, #tpu.memory_space<vmem>>, vector<256x128xf32>
    tpu.vector_store %arg7[%c0_6, %c0_7], %7 {strides = array<i32>} : memref<256x128xf32, #tpu.memory_space<vmem>>, vector<256x128xf32>,
    %c0_i32_8 = arith.constant 0 : i32
    %9 = arith.cmpi eq, %arg1, %c0_i32_8 : i32
    %10 = arith.extui %9 : i1 to i32
    %c0_i32_9 = arith.constant 0 : i32
    %11 = arith.cmpi ne, %10, %c0_i32_9 : i32
    scf.if %11 {
      %c0_10 = arith.constant 0 : index
      %c0_11 = arith.constant 0 : index
      %12 = vector.load %arg7[%c0_10, %c0_11] : memref<256x128xf32, #tpu.memory_space<vmem>>, vector<256x128xf32>
      %c0_12 = arith.constant 0 : index
      %c0_13 = arith.constant 0 : index
      %13 = vector.load %arg4[%c0_12, %c0_13] : memref<256x1xf32, #tpu.memory_space<vmem>>, vector<256x1xf32>
      %14 = vector.broadcast %13 : vector<256x1xf32> to vector<256x128xf32>
      %15 = arith.mulf %12, %14 : vector<256x128xf32>
      %cst_14 = arith.constant 0.000000e+00 : f32
      %16 = vector.broadcast %cst_14 : f32 to vector<256x128xf32>
      %17 = arith.cmpf ogt, %15, %16 : vector<256x128xf32>
      %cst_15 = arith.constant 0.00999999977 : f32
      %18 = vector.broadcast %cst_15 : f32 to vector<256x128xf32>
      %19 = arith.mulf %18, %15 : vector<256x128xf32>
      %20 = arith.select %17, %15, %19 : vector<256x128xi1>, vector<256x128xf32>
      %c0_16 = arith.constant 0 : index
      %c0_17 = arith.constant 0 : index
      %21 = vector.load %arg5[%c0_16, %c0_17] : memref<256x128xf32, #tpu.memory_space<vmem>>, vector<256x128xf32>
      %c0_18 = arith.constant 0 : index
      %c0_19 = arith.constant 0 : index
      %22 = vector.load %arg6[%c0_18, %c0_19] : memref<256x128xf32, #tpu.memory_space<vmem>>, vector<256x128xf32>
      %23 = arith.addf %21, %22 : vector<256x128xf32>
      %24 = arith.addf %23, %20 : vector<256x128xf32>
      %c0_20 = arith.constant 0 : index
      %c0_21 = arith.constant 0 : index
      %25 = vector.load %arg7[%c0_20, %c0_21] : memref<256x128xf32, #tpu.memory_space<vmem>>, vector<256x128xf32>
      tpu.vector_store %arg7[%c0_20, %c0_21], %24 {strides = array<i32>} : memref<256x128xf32, #tpu.memory_space<vmem>>, vector<256x128xf32>,
    } else {
    }
    return
  }
  func.func @transform_0(%arg0: i32, %arg1: i32) -> (i32, i32) {
    %c0_i32 = arith.constant 0 : i32
    return %arg0, %arg1 : i32, i32
  }
  func.func @transform_1(%arg0: i32, %arg1: i32) -> (i32, i32) {
    %c0_i32 = arith.constant 0 : i32
    %c0_i32_0 = arith.constant 0 : i32
    return %arg1, %c0_i32 : i32, i32
  }
  func.func @transform_2(%arg0: i32, %arg1: i32) -> (i32, i32) {
    %c0_i32 = arith.constant 0 : i32
    %c0_i32_0 = arith.constant 0 : i32
    return %arg0, %c0_i32 : i32, i32
  }
  func.func @transform_3(%arg0: i32, %arg1: i32) -> (i32, i32) {
    %c0_i32 = arith.constant 0 : i32
    %c0_i32_0 = arith.constant 0 : i32
    return %arg0, %c0_i32 : i32, i32
  }
  func.func @transform_4(%arg0: i32, %arg1: i32) -> (i32, i32) {
    %c0_i32 = arith.constant 0 : i32
    %c0_i32_0 = arith.constant 0 : i32
    return %arg0, %c0_i32 : i32, i32
  }
  func.func @transform_5(%arg0: i32, %arg1: i32) -> (i32, i32) {
    %c0_i32 = arith.constant 0 : i32
    %c0_i32_0 = arith.constant 0 : i32
    return %arg0, %c0_i32 : i32, i32
  }
}

</mosaic_0001>

<bundles_post_ra>
// kernel: egcn_apply.7
= control target key start
LH: loop header
LB: loop body
LE: loop exit
PB: predicated region body
PF: predicated region fallthrough
CT: control target
= control target key end

     0   :  { %s1072_s0 = inlined_call_operand.vmem [shape: f32[256,128], index: 0, kind: input, shape index: {}]   ;;  %s1073_s1 = inlined_call_operand.vmem [shape: f32[256,128], index: 1, kind: output, shape index: {0}]   ;;  %s1074_s2 = inlined_call_operand.vmem [shape: bf16[256,128], index: 2, kind: output, shape index: {1}]  }
   0x1   :  { %v675_v0 = vld [vmem:[%s1072_s0 + $0x10] sm:$0xff]  ;;  %v680_v1 = vld [vmem:[%s1072_s0] sm:$0xff]  ;;  %v685_v2 = vld [vmem:[%s1072_s0 + $0x18] sm:$0xff] }
   0x2   :  { %v44_v3 = vmul.f32 %v675_v0, %v675_v0  ;;  %v42_v4 = vmul.f32 %v680_v1, %v680_v1  ;;  %v694_v5 = vld [vmem:[%s1072_s0 + $0x8] sm:$0xff]  ;;  %v45_v6 = vmul.f32 %v685_v2, %v685_v2  ;;  %v708_v9 = vld [vmem:[%s1072_s0 + $0x20] sm:$0xff]  ;;  %v717_v12 = vld [vmem:[%s1072_s0 + $0x38] sm:$0xff] }
   0x3   :  { %v43_v7 = vmul.f32 %v694_v5, %v694_v5  ;;  %v703_v8 = vld [vmem:[%s1072_s0 + $0x28] sm:$0xff]  ;;  %v46_v11 = vmul.f32 %v708_v9, %v708_v9  ;;  %v722_v13 = vld [vmem:[%s1072_s0 + $0x30] sm:$0xff]  ;;  %v49_v14 = vmul.f32 %v717_v12, %v717_v12  ;;  %v736_v17 = vld [vmem:[%s1072_s0 + $0x40] sm:$0xff] }
   0x4   :  { %78 = vadd.xlane.f32.xlu1 %v44_v3  ;;  %74 = vadd.xlane.f32.xlu0 %v42_v4  ;;  %v47_v10 = vmul.f32 %v703_v8, %v703_v8  ;;  %v48_v15 = vmul.f32 %v722_v13, %v722_v13  ;;  %v731_v16 = vld [vmem:[%s1072_s0 + $0x48] sm:$0xff]  ;;  %v50_v19 = vmul.f32 %v736_v17, %v736_v17  ;;  %v745_v20 = vld [vmem:[%s1072_s0 + $0x58] sm:$0xff]  ;;  %v750_v21 = vld [vmem:[%s1072_s0 + $0x50] sm:$0xff] }
   0x5   :  { %v51_v18 = vmul.f32 %v731_v16, %v731_v16  ;;  %v53_v22 = vmul.f32 %v745_v20, %v745_v20  ;;  %v52_v23 = vmul.f32 %v750_v21, %v750_v21  ;;  %v759_v24 = vld [vmem:[%s1072_s0 + $0x68] sm:$0xff]  ;;  %v764_v25 = vld [vmem:[%s1072_s0 + $0x60] sm:$0xff]  ;;  %v773_v28 = vld [vmem:[%s1072_s0 + $0x78] sm:$0xff] }
   0x6   :  { %v55_v26 = vmul.f32 %v759_v24, %v759_v24  ;;  %v54_v27 = vmul.f32 %v764_v25, %v764_v25  ;;  %v778_v29 = vld [vmem:[%s1072_s0 + $0x70] sm:$0xff]  ;;  %v57_v30 = vmul.f32 %v773_v28, %v773_v28  ;;  %v787_v32 = vld [vmem:[%s1072_s0 + $0x88] sm:$0xff]  ;;  %v792_v33 = vld [vmem:[%s1072_s0 + $0x80] sm:$0xff] }
   0x7   :  { %v56_v31 = vmul.f32 %v778_v29, %v778_v29  ;;  %v59_v34 = vmul.f32 %v787_v32, %v787_v32  ;;  %v58_v35 = vmul.f32 %v792_v33, %v792_v33  ;;  %v801_v36 = vld [vmem:[%s1072_s0 + $0x98] sm:$0xff]  ;;  %v806_v37 = vld [vmem:[%s1072_s0 + $0x90] sm:$0xff]  ;;  %v815_v40 = vld [vmem:[%s1072_s0 + $0xa8] sm:$0xff] }
   0x8   :  { %80 = vadd.xlane.f32.xlu1 %v45_v6  ;;  %76 = vadd.xlane.f32.xlu0 %v43_v7  ;;  %v61_v38 = vmul.f32 %v801_v36, %v801_v36  ;;  %v60_v39 = vmul.f32 %v806_v37, %v806_v37  ;;  %v820_v41 = vld [vmem:[%s1072_s0 + $0xa0] sm:$0xff]  ;;  %v63_v42 = vmul.f32 %v815_v40, %v815_v40  ;;  %v829_v44 = vld [vmem:[%s1072_s0 + $0xb8] sm:$0xff]  ;;  %v834_v45 = vld [vmem:[%s1072_s0 + $0xb0] sm:$0xff] }
   0x9   :  { %v62_v43 = vmul.f32 %v820_v41, %v820_v41  ;;  %v65_v46 = vmul.f32 %v829_v44, %v829_v44  ;;  %v64_v47 = vmul.f32 %v834_v45, %v834_v45  ;;  %v843_v48 = vld [vmem:[%s1072_s0 + $0xc8] sm:$0xff]  ;;  %v848_v49 = vld [vmem:[%s1072_s0 + $0xc0] sm:$0xff]  ;;  %v857_v52 = vld [vmem:[%s1072_s0 + $0xd8] sm:$0xff] }
   0xa   :  { %v67_v50 = vmul.f32 %v843_v48, %v843_v48  ;;  %v66_v51 = vmul.f32 %v848_v49, %v848_v49  ;;  %v862_v53 = vld [vmem:[%s1072_s0 + $0xd0] sm:$0xff]  ;;  %v69_v54 = vmul.f32 %v857_v52, %v857_v52  ;;  %v871_v56 = vld [vmem:[%s1072_s0 + $0xe8] sm:$0xff]  ;;  %v876_v57 = vld [vmem:[%s1072_s0 + $0xe0] sm:$0xff] }
   0xb   :  { %v68_v55 = vmul.f32 %v862_v53, %v862_v53  ;;  %v71_v58 = vmul.f32 %v871_v56, %v871_v56  ;;  %v70_v59 = vmul.f32 %v876_v57, %v876_v57  ;;  %v885_v60 = vld [vmem:[%s1072_s0 + $0xf8] sm:$0xff]  ;;  %v890_v61 = vld [vmem:[%s1072_s0 + $0xf0] sm:$0xff] }
   0xc   :  { %84 = vadd.xlane.f32.xlu1 %v47_v10  ;;  %82 = vadd.xlane.f32.xlu0 %v46_v11  ;;  %v73_v62 = vmul.f32 %v885_v60, %v885_v60  ;;  %v72_v63 = vmul.f32 %v890_v61, %v890_v61 }
  0x10   :  { %88 = vadd.xlane.f32.xlu1 %v49_v14  ;;  %86 = vadd.xlane.f32.xlu0 %v48_v15 }
  0x14   :  { %92 = vadd.xlane.f32.xlu1 %v51_v18  ;;  %90 = vadd.xlane.f32.xlu0 %v50_v19 }
  0x18   :  { %96 = vadd.xlane.f32.xlu1 %v53_v22  ;;  %94 = vadd.xlane.f32.xlu0 %v52_v23 }
  0x1c   :  { %100 = vadd.xlane.f32.xlu1 %v55_v26  ;;  %98 = vadd.xlane.f32.xlu0 %v54_v27 }
  0x20   :  { %104 = vadd.xlane.f32.xlu1 %v57_v30  ;;  %102 = vadd.xlane.f32.xlu0 %v56_v31 }
  0x24   :  { %108 = vadd.xlane.f32.xlu1 %v59_v34  ;;  %106 = vadd.xlane.f32.xlu0 %v58_v35 }
  0x28   :  { %112 = vadd.xlane.f32.xlu1 %v61_v38  ;;  %110 = vadd.xlane.f32.xlu0 %v60_v39 }
  0x2c   :  { %116 = vadd.xlane.f32.xlu1 %v63_v42  ;;  %114 = vadd.xlane.f32.xlu0 %v62_v43 }
  0x30   :  { %120 = vadd.xlane.f32.xlu1 %v65_v46  ;;  %118 = vadd.xlane.f32.xlu0 %v64_v47 }
  0x34   :  { %124 = vadd.xlane.f32.xlu1 %v67_v50  ;;  %122 = vadd.xlane.f32.xlu0 %v66_v51 }
  0x38   :  { %128 = vadd.xlane.f32.xlu1 %v69_v54  ;;  %126 = vadd.xlane.f32.xlu0 %v68_v55 }
  0x3c   :  { %132 = vadd.xlane.f32.xlu1 %v71_v58  ;;  %130 = vadd.xlane.f32.xlu0 %v70_v59 }
  0x40   :  { %136 = vadd.xlane.f32.xlu1 %v73_v62  ;;  %134 = vadd.xlane.f32.xlu0 %v72_v63 }
  0x91   :  { %v79_v3 = vpop.xlane.xlu1 %78  ;;  %v75_v4 = vpop.xlane.xlu0 %74 }
  0x92   :  { %v140_v6 = vmax.f32 %v79_v3, 1e-24  ;;  %v138_v7 = vmax.f32 %v75_v4, 1e-24 }
  0x94   :  { %593 = vrsqrt.f32 %v140_v6 }
  0x95   :  { %595 = vrsqrt.f32 %v138_v7  ;;  %v81_v10 = vpop.xlane.xlu1 %80  ;;  %v77_v11 = vpop.xlane.xlu0 %76 }
  0x96   :  { %v141_v14 = vmax.f32 %v81_v10, 1e-24  ;;  %v139_v15 = vmax.f32 %v77_v11, 1e-24 }
  0x98   :  { %597 = vrsqrt.f32 %v141_v14 }
  0x99   :  { %599 = vrsqrt.f32 %v139_v15  ;;  %v85_v18 = vpop.xlane.xlu1 %84  ;;  %v83_v19 = vpop.xlane.xlu0 %82 }
  0x9a   :  { %v143_v22 = vmax.f32 %v85_v18, 1e-24  ;;  %v142_v23 = vmax.f32 %v83_v19, 1e-24 }
  0x9c   :  { %601 = vrsqrt.f32 %v143_v22 }
  0x9d   :  { %603 = vrsqrt.f32 %v142_v23  ;;  %v89_v26 = vpop.xlane.xlu1 %88  ;;  %v87_v27 = vpop.xlane.xlu0 %86 }
  0x9e   :  { %v594_v30 = vpop.eup %593  ;;  %v145_v31 = vmax.f32 %v89_v26, 1e-24  ;;  %v144_v34 = vmax.f32 %v87_v27, 1e-24 }
  0x9f   :  { %v596_v35 = vpop.eup %595  ;;  %v204_v38 = vmul.f32 %v594_v30, %v675_v0 }
  0xa0   :  { %v202_v39 = vmul.f32 %v596_v35, %v680_v1  ;;  %605 = vrsqrt.f32 %v145_v31 }
  0xa1   :  { %236 = vst [vmem:[%s1073_s1 + $0x10] sm:$0xff] %v204_v38  ;;  %607 = vrsqrt.f32 %v144_v34  ;;  %v93_v42 = vpop.xlane.xlu1 %92  ;;  %v91_v43 = vpop.xlane.xlu0 %90 }
  0xa2   :  { %v598_v46 = vpop.eup %597  ;;  %234 = vst [vmem:[%s1073_s1] sm:$0xff] %v202_v39  ;;  %v147_v47 = vmax.f32 %v93_v42, 1e-24  ;;  %v146_v50 = vmax.f32 %v91_v43, 1e-24 }
  0xa3   :  { %v600_v51 = vpop.eup %599  ;;  %v205_v0 = vmul.f32 %v598_v46, %v685_v2 }
  0xa4   :  { %v203_v1 = vmul.f32 %v600_v51, %v694_v5  ;;  %609 = vrsqrt.f32 %v147_v47 }
  0xa5   :  { %237 = vst [vmem:[%s1073_s1 + $0x18] sm:$0xff] %v205_v0  ;;  %v506_v54 = vpack.c.bf16 %v205_v0, %v204_v38  ;;  %611 = vrsqrt.f32 %v146_v50  ;;  %v97_v55 = vpop.xlane.xlu1 %96  ;;  %v95_v58 = vpop.xlane.xlu0 %94 }
  0xa6   :  { %v602_v59 = vpop.eup %601  ;;  %235 = vst [vmem:[%s1073_s1 + $0x8] sm:$0xff] %v203_v1  ;;  %v501_v62 = vpack.c.bf16 %v203_v1, %v202_v39  ;;  %v149_v63 = vmax.f32 %v97_v55, 1e-24  ;;  %v148_v3 = vmax.f32 %v95_v58, 1e-24 }
  0xa7   :  { %v604_v2 = vpop.eup %603  ;;  %578 = vst [vmem:[%s1074_s2 + $0x8] sm:$0xff] %v506_v54   ;;  %v207_v5 = vmul.f32 %v602_v59, %v703_v8 }
  0xa8   :  { %502 = vst [vmem:[%s1074_s2] sm:$0xff] %v501_v62   ;;  %v206_v4 = vmul.f32 %v604_v2, %v708_v9  ;;  %613 = vrsqrt.f32 %v149_v63 }
  0xa9   :  { %239 = vst [vmem:[%s1073_s1 + $0x28] sm:$0xff] %v207_v5  ;;  %615 = vrsqrt.f32 %v148_v3  ;;  %v101_v6 = vpop.xlane.xlu1 %100  ;;  %v99_v7 = vpop.xlane.xlu0 %98 }
  0xaa   :  { %v606_v10 = vpop.eup %605  ;;  %238 = vst [vmem:[%s1073_s1 + $0x20] sm:$0xff] %v206_v4  ;;  %v511_v8 = vpack.c.bf16 %v207_v5, %v206_v4  ;;  %v151_v11 = vmax.f32 %v101_v6, 1e-24  ;;  %v150_v14 = vmax.f32 %v99_v7, 1e-24 }
  0xab   :  { %v608_v15 = vpop.eup %607  ;;  %v209_v18 = vmul.f32 %v606_v10, %v717_v12 }
  0xac   :  { %579 = vst [vmem:[%s1074_s2 + $0x10] sm:$0xff] %v511_v8   ;;  %v208_v9 = vmul.f32 %v608_v15, %v722_v13  ;;  %617 = vrsqrt.f32 %v151_v11 }
  0xad   :  { %241 = vst [vmem:[%s1073_s1 + $0x38] sm:$0xff] %v209_v18  ;;  %619 = vrsqrt.f32 %v150_v14  ;;  %v105_v19 = vpop.xlane.xlu1 %104  ;;  %v103_v22 = vpop.xlane.xlu0 %102 }
  0xae   :  { %v610_v23 = vpop.eup %609  ;;  %240 = vst [vmem:[%s1073_s1 + $0x30] sm:$0xff] %v208_v9  ;;  %v516_v12 = vpack.c.bf16 %v209_v18, %v208_v9  ;;  %v153_v26 = vmax.f32 %v105_v19, 1e-24  ;;  %v152_v27 = vmax.f32 %v103_v22, 1e-24 }
  0xaf   :  { %v612_v30 = vpop.eup %611  ;;  %v211_v31 = vmul.f32 %v610_v23, %v731_v16 }
  0xb0   :  { %580 = vst [vmem:[%s1074_s2 + $0x18] sm:$0xff] %v516_v12   ;;  %v210_v13 = vmul.f32 %v612_v30, %v736_v17  ;;  %621 = vrsqrt.f32 %v153_v26 }
  0xb1   :  { %243 = vst [vmem:[%s1073_s1 + $0x48] sm:$0xff] %v211_v31  ;;  %623 = vrsqrt.f32 %v152_v27  ;;  %v109_v34 = vpop.xlane.xlu1 %108  ;;  %v107_v35 = vpop.xlane.xlu0 %106 }
  0xb2   :  { %v614_v38 = vpop.eup %613  ;;  %242 = vst [vmem:[%s1073_s1 + $0x40] sm:$0xff] %v210_v13  ;;  %v521_v16 = vpack.c.bf16 %v211_v31, %v210_v13  ;;  %v155_v39 = vmax.f32 %v109_v34, 1e-24  ;;  %v154_v42 = vmax.f32 %v107_v35, 1e-24 }
  0xb3   :  { %v616_v43 = vpop.eup %615  ;;  %v213_v46 = vmul.f32 %v614_v38, %v745_v20 }
  0xb4   :  { %581 = vst [vmem:[%s1074_s2 + $0x20] sm:$0xff] %v521_v16   ;;  %v212_v17 = vmul.f32 %v616_v43, %v750_v21  ;;  %625 = vrsqrt.f32 %v155_v39 }
  0xb5   :  { %245 = vst [vmem:[%s1073_s1 + $0x58] sm:$0xff] %v213_v46  ;;  %627 = vrsqrt.f32 %v154_v42  ;;  %v113_v47 = vpop.xlane.xlu1 %112  ;;  %v111_v50 = vpop.xlane.xlu0 %110 }
  0xb6   :  { %v618_v51 = vpop.eup %617  ;;  %244 = vst [vmem:[%s1073_s1 + $0x50] sm:$0xff] %v212_v17  ;;  %v526_v20 = vpack.c.bf16 %v213_v46, %v212_v17  ;;  %v157_v0 = vmax.f32 %v113_v47, 1e-24  ;;  %v156_v1 = vmax.f32 %v111_v50, 1e-24 }
  0xb7   :  { %v620_v54 = vpop.eup %619  ;;  %v215_v55 = vmul.f32 %v618_v51, %v759_v24 }
  0xb8   :  { %582 = vst [vmem:[%s1074_s2 + $0x28] sm:$0xff] %v526_v20   ;;  %v214_v21 = vmul.f32 %v620_v54, %v764_v25  ;;  %629 = vrsqrt.f32 %v157_v0 }
  0xb9   :  { %247 = vst [vmem:[%s1073_s1 + $0x68] sm:$0xff] %v215_v55  ;;  %631 = vrsqrt.f32 %v156_v1  ;;  %v117_v58 = vpop.xlane.xlu1 %116  ;;  %v115_v59 = vpop.xlane.xlu0 %114 }
  0xba   :  { %v622_v62 = vpop.eup %621  ;;  %246 = vst [vmem:[%s1073_s1 + $0x60] sm:$0xff] %v214_v21  ;;  %v531_v24 = vpack.c.bf16 %v215_v55, %v214_v21  ;;  %v159_v63 = vmax.f32 %v117_v58, 1e-24  ;;  %v158_v3 = vmax.f32 %v115_v59, 1e-24 }
  0xbb   :  { %v624_v2 = vpop.eup %623  ;;  %v217_v5 = vmul.f32 %v622_v62, %v773_v28 }
  0xbc   :  { %583 = vst [vmem:[%s1074_s2 + $0x30] sm:$0xff] %v531_v24   ;;  %v216_v25 = vmul.f32 %v624_v2, %v778_v29  ;;  %633 = vrsqrt.f32 %v159_v63 }
  0xbd   :  { %249 = vst [vmem:[%s1073_s1 + $0x78] sm:$0xff] %v217_v5  ;;  %635 = vrsqrt.f32 %v158_v3  ;;  %v121_v4 = vpop.xlane.xlu1 %120  ;;  %v119_v6 = vpop.xlane.xlu0 %118 }
  0xbe   :  { %v626_v7 = vpop.eup %625  ;;  %248 = vst [vmem:[%s1073_s1 + $0x70] sm:$0xff] %v216_v25  ;;  %v536_v28 = vpack.c.bf16 %v217_v5, %v216_v25  ;;  %v161_v10 = vmax.f32 %v121_v4, 1e-24  ;;  %v160_v8 = vmax.f32 %v119_v6, 1e-24 }
  0xbf   :  { %v628_v11 = vpop.eup %627  ;;  %v219_v14 = vmul.f32 %v626_v7, %v787_v32 }
  0xc0   :  { %584 = vst [vmem:[%s1074_s2 + $0x38] sm:$0xff] %v536_v28   ;;  %v218_v29 = vmul.f32 %v628_v11, %v792_v33  ;;  %637 = vrsqrt.f32 %v161_v10 }
  0xc1   :  { %251 = vst [vmem:[%s1073_s1 + $0x88] sm:$0xff] %v219_v14  ;;  %639 = vrsqrt.f32 %v160_v8  ;;  %v125_v15 = vpop.xlane.xlu1 %124  ;;  %v123_v18 = vpop.xlane.xlu0 %122 }
  0xc2   :  { %v630_v9 = vpop.eup %629  ;;  %250 = vst [vmem:[%s1073_s1 + $0x80] sm:$0xff] %v218_v29  ;;  %v541_v32 = vpack.c.bf16 %v219_v14, %v218_v29  ;;  %v163_v19 = vmax.f32 %v125_v15, 1e-24  ;;  %v162_v22 = vmax.f32 %v123_v18, 1e-24 }
  0xc3   :  { %v632_v23 = vpop.eup %631  ;;  %v221_v12 = vmul.f32 %v630_v9, %v801_v36 }
  0xc4   :  { %585 = vst [vmem:[%s1074_s2 + $0x40] sm:$0xff] %v541_v32   ;;  %v220_v33 = vmul.f32 %v632_v23, %v806_v37  ;;  %641 = vrsqrt.f32 %v163_v19 }
  0xc5   :  { %253 = vst [vmem:[%s1073_s1 + $0x98] sm:$0xff] %v221_v12  ;;  %643 = vrsqrt.f32 %v162_v22  ;;  %v129_v26 = vpop.xlane.xlu1 %128  ;;  %v127_v27 = vpop.xlane.xlu0 %126 }
  0xc6   :  { %v634_v30 = vpop.eup %633  ;;  %252 = vst [vmem:[%s1073_s1 + $0x90] sm:$0xff] %v220_v33  ;;  %v546_v36 = vpack.c.bf16 %v221_v12, %v220_v33  ;;  %v165_v31 = vmax.f32 %v129_v26, 1e-24  ;;  %v164_v13 = vmax.f32 %v127_v27, 1e-24 }
  0xc7   :  { %v636_v34 = vpop.eup %635  ;;  %v223_v35 = vmul.f32 %v634_v30, %v815_v40 }
  0xc8   :  { %586 = vst [vmem:[%s1074_s2 + $0x48] sm:$0xff] %v546_v36   ;;  %v222_v37 = vmul.f32 %v636_v34, %v820_v41  ;;  %645 = vrsqrt.f32 %v165_v31 }
  0xc9   :  { %255 = vst [vmem:[%s1073_s1 + $0xa8] sm:$0xff] %v223_v35  ;;  %647 = vrsqrt.f32 %v164_v13  ;;  %v133_v38 = vpop.xlane.xlu1 %132  ;;  %v131_v16 = vpop.xlane.xlu0 %130 }
  0xca   :  { %v638_v39 = vpop.eup %637  ;;  %254 = vst [vmem:[%s1073_s1 + $0xa0] sm:$0xff] %v222_v37  ;;  %v551_v40 = vpack.c.bf16 %v223_v35, %v222_v37  ;;  %v167_v42 = vmax.f32 %v133_v38, 1e-24  ;;  %v166_v43 = vmax.f32 %v131_v16, 1e-24 }
  0xcb   :  { %v640_v46 = vpop.eup %639  ;;  %v225_v17 = vmul.f32 %v638_v39, %v829_v44 }
  0xcc   :  { %587 = vst [vmem:[%s1074_s2 + $0x50] sm:$0xff] %v551_v40   ;;  %v224_v41 = vmul.f32 %v640_v46, %v834_v45  ;;  %649 = vrsqrt.f32 %v167_v42 }
  0xcd   :  { %257 = vst [vmem:[%s1073_s1 + $0xb8] sm:$0xff] %v225_v17  ;;  %651 = vrsqrt.f32 %v166_v43  ;;  %v137_v47 = vpop.xlane.xlu1 %136  ;;  %v135_v50 = vpop.xlane.xlu0 %134 }
  0xce   :  { %v642_v51 = vpop.eup %641  ;;  %256 = vst [vmem:[%s1073_s1 + $0xb0] sm:$0xff] %v224_v41  ;;  %v556_v44 = vpack.c.bf16 %v225_v17, %v224_v41  ;;  %v169_v20 = vmax.f32 %v137_v47, 1e-24  ;;  %v168_v0 = vmax.f32 %v135_v50, 1e-24 }
  0xcf   :  { %v644_v1 = vpop.eup %643  ;;  %v227_v54 = vmul.f32 %v642_v51, %v843_v48 }
  0xd0   :  { %588 = vst [vmem:[%s1074_s2 + $0x58] sm:$0xff] %v556_v44   ;;  %v226_v45 = vmul.f32 %v644_v1, %v848_v49  ;;  %653 = vrsqrt.f32 %v169_v20 }
  0xd1   :  { %259 = vst [vmem:[%s1073_s1 + $0xc8] sm:$0xff] %v227_v54  ;;  %655 = vrsqrt.f32 %v168_v0 }
  0xd2   :  { %v646_v55 = vpop.eup %645  ;;  %258 = vst [vmem:[%s1073_s1 + $0xc0] sm:$0xff] %v226_v45  ;;  %v561_v21 = vpack.c.bf16 %v227_v54, %v226_v45 }
  0xd3   :  { %v648_v58 = vpop.eup %647  ;;  %v229_v48 = vmul.f32 %v646_v55, %v857_v52 }
  0xd4   :  { %589 = vst [vmem:[%s1074_s2 + $0x60] sm:$0xff] %v561_v21   ;;  %v228_v49 = vmul.f32 %v648_v58, %v862_v53 }
  0xd5   :  { %261 = vst [vmem:[%s1073_s1 + $0xd8] sm:$0xff] %v229_v48 }
  0xd6   :  { %v650_v59 = vpop.eup %649  ;;  %260 = vst [vmem:[%s1073_s1 + $0xd0] sm:$0xff] %v228_v49  ;;  %v566_v62 = vpack.c.bf16 %v229_v48, %v228_v49 }
  0xd7   :  { %v652_v24 = vpop.eup %651  ;;  %v231_v63 = vmul.f32 %v650_v59, %v871_v56 }
  0xd8   :  { %590 = vst [vmem:[%s1074_s2 + $0x68] sm:$0xff] %v566_v62   ;;  %v230_v52 = vmul.f32 %v652_v24, %v876_v57 }
  0xd9   :  { %263 = vst [vmem:[%s1073_s1 + $0xe8] sm:$0xff] %v231_v63 }
  0xda   :  { %v654_v53 = vpop.eup %653  ;;  %262 = vst [vmem:[%s1073_s1 + $0xe0] sm:$0xff] %v230_v52  ;;  %v571_v3 = vpack.c.bf16 %v231_v63, %v230_v52 }
  0xdb   :  { %v656_v2 = vpop.eup %655  ;;  %v233_v5 = vmul.f32 %v654_v53, %v885_v60 }
  0xdc   :  { %591 = vst [vmem:[%s1074_s2 + $0x70] sm:$0xff] %v571_v3   ;;  %v232_v56 = vmul.f32 %v656_v2, %v890_v61 }
  0xdd   :  { %265 = vst [vmem:[%s1073_s1 + $0xf8] sm:$0xff] %v233_v5 }
  0xde   :  { %264 = vst [vmem:[%s1073_s1 + $0xf0] sm:$0xff] %v232_v56  ;;  %v576_v57 = vpack.c.bf16 %v233_v5, %v232_v56 }
  0xe0   :  { %592 = vst [vmem:[%s1074_s2 + $0x78] sm:$0xff] %v576_v57  }

// kernel: egcn_apply.8
= control target key start
LH: loop header
LB: loop body
LE: loop exit
PB: predicated region body
PF: predicated region fallthrough
CT: control target
= control target key end

     0   :  { %v1588_v1 = vmov 0   ;;  %s2040_s1 = inlined_call_operand.vmem [shape: bf16[256,128], index: 1, kind: input, shape index: {}]   ;;  %s2041_s0 = inlined_call_operand.vmem [shape: bf16[256,256], index: 0, kind: input, shape index: {}]   ;;  %s2042_s2 = inlined_call_operand.vmem [shape: f32[256,1], index: 2, kind: input, shape index: {}]   ;;  %s2043_s3 = inlined_call_operand.vmem [shape: f32[256,128], index: 3, kind: output, shape index: {0}]   ;;  %s2044_s4 = inlined_call_operand.vmem [shape: bf16[256,128], index: 4, kind: output, shape index: {1}]  }
   0x1   :  { %v1524_v0 = vld [vmem:[%s2040_s1 + $0x40] sm:$0xff]   ;;  %1523 = vset.pattern.permute.xlu1 %v1588_v1  ;;  %1522 = vset.pattern.permute.xlu0 %v1588_v1  ;;  %v1526_v3 = vld [vmem:[%s2040_s1 + $0x48] sm:$0xff]   ;;  %v1528_v5 = vld [vmem:[%s2040_s1 + $0x50] sm:$0xff]  }
   0x2   :  { %v1525_v2 = vld [vmem:[%s2040_s1] sm:$0xff]   ;;  %1392 = vmatprep.subr.bf16.mxu0 %v1524_v0  ;;  %1504 = vmatprep.subr.bf16.mxu1 %v1524_v0  ;;  %v1527_v4 = vld [vmem:[%s2040_s1 + $0x8] sm:$0xff]   ;;  %v1529_v6 = vld [vmem:[%s2040_s1 + $0x10] sm:$0xff]  }
   0x3   :  { %1393 = vmatpush3.bf16.msra.mxu0 %v1525_v2  ;;  %1512 = vmatpush3.bf16.msra.mxu1 %v1525_v2  ;;  %v1530_v7 = vld [vmem:[%s2040_s1 + $0x58] sm:$0xff]   ;;  %v1532_v9 = vld [vmem:[%s2040_s1 + $0x60] sm:$0xff]   ;;  %v1534_v11 = vld [vmem:[%s2040_s1 + $0x68] sm:$0xff]  }
   0x4   :  { %1394 = vmatprep.subr.bf16.mxu0 %v1526_v3  ;;  %1505 = vmatprep.subr.bf16.mxu1 %v1526_v3  ;;  %v1531_v8 = vld [vmem:[%s2040_s1 + $0x18] sm:$0xff]   ;;  %v1533_v10 = vld [vmem:[%s2040_s1 + $0x20] sm:$0xff]   ;;  %v1535_v14 = vld [vmem:[%s2040_s1 + $0x28] sm:$0xff]  }
   0x5   :  { %v1542_v12 = vld [vmem:[%s2041_s0 + $0x4] ss:$8 sps:$4 sm:$0xff]   ;;  %v1536_v15 = vld [vmem:[%s2040_s1 + $0x70] sm:$0xff]   ;;  %v1538_v17 = vld [vmem:[%s2040_s1 + $0x78] sm:$0xff]  }
   0x6   :  { %v1545_v13 = vld [vmem:[%s2041_s0 + $0x84] ss:$8 sps:$4 sm:$0xff]   ;;  %437 = vmatprep.mubr.bf16.mxu0 %v1542_v12  ;;  %v1537_v16 = vld [vmem:[%s2040_s1 + $0x30] sm:$0xff]   ;;  %v1539_v18 = vld [vmem:[%s2040_s1 + $0x38] sm:$0xff]  }
   0x7   :  { %1395 = vmatpush3.bf16.msra.mxu0 %v1527_v4  ;;  %1513 = vmatpush3.bf16.msra.mxu1 %v1527_v4  ;;  %v1540_v19 = vld [vmem:[%s2041_s0] ss:$8 sps:$4 sm:$0xff]   ;;  %v667_v20 = vld [vmem:[%s2042_s2 + $0x10] sm:$0xff]  ;;  %v668_v25 = vld [vmem:[%s2042_s2 + $0x18] sm:$0xff] }
   0x8   :  { %1396 = vmatprep.subr.bf16.mxu0 %v1528_v5  ;;  %1506 = vmatprep.subr.bf16.mxu1 %v1528_v5  ;;  %v665_v21 = vld [vmem:[%s2042_s2] sm:$0xff]  ;;  %v1546_v23 = vld [vmem:[%s2041_s0 + $0x14] ss:$8 sps:$4 sm:$0xff]   ;;  %v666_v26 = vld [vmem:[%s2042_s2 + $0x8] sm:$0xff] }
   0x9   :  { %501 = vmatprep.mubr.bf16.mxu1 %v1545_v13  ;;  %v1543_v22 = vld [vmem:[%s2041_s0 + $0x80] ss:$8 sps:$4 sm:$0xff]   ;;  %709 = vperm.xlu1 %1523, %v667_v20   ;;  %v1548_v24 = vld [vmem:[%s2041_s0 + $0x94] ss:$8 sps:$4 sm:$0xff]   ;;  %v1550_v27 = vld [vmem:[%s2041_s0 + $0x10] ss:$8 sps:$4 sm:$0xff]  }
   0xa   :  { %699 = vperm.xlu0 %1522, %v665_v21   ;;  %v670_v28 = vld [vmem:[%s2042_s2 + $0x28] sm:$0xff]  ;;  %v669_v29 = vld [vmem:[%s2042_s2 + $0x20] sm:$0xff]  ;;  %v1551_v30 = vld [vmem:[%s2041_s0 + $0x90] ss:$8 sps:$4 sm:$0xff]  }
   0xb   :  { %1397 = vmatpush3.bf16.msra.mxu0 %v1529_v6  ;;  %1514 = vmatpush3.bf16.msra.mxu1 %v1529_v6  ;;  %v1552_v31 = vld [vmem:[%s2041_s0 + $0x24] ss:$8 sps:$4 sm:$0xff]   ;;  %v672_v33 = vld [vmem:[%s2042_s2 + $0x38] sm:$0xff]  ;;  %v671_v34 = vld [vmem:[%s2042_s2 + $0x30] sm:$0xff] }
   0xc   :  { %1398 = vmatprep.subr.bf16.mxu0 %v1530_v7  ;;  %1507 = vmatprep.subr.bf16.mxu1 %v1530_v7  ;;  %v1554_v32 = vld [vmem:[%s2041_s0 + $0xa4] ss:$8 sps:$4 sm:$0xff]   ;;  %v1556_v37 = vld [vmem:[%s2041_s0 + $0x20] ss:$8 sps:$4 sm:$0xff]   ;;  %v1558_v39 = vld [vmem:[%s2041_s0 + $0x34] ss:$8 sps:$4 sm:$0xff]  }
   0xd   :  { %714 = vperm.xlu1 %1523, %v668_v25   ;;  %v674_v35 = vld [vmem:[%s2042_s2 + $0x48] sm:$0xff]  ;;  %v673_v36 = vld [vmem:[%s2042_s2 + $0x40] sm:$0xff]  ;;  %v1560_v40 = vld [vmem:[%s2041_s0 + $0xb4] ss:$8 sps:$4 sm:$0xff]  }
   0xe   :  { %704 = vperm.xlu0 %1522, %v666_v26   ;;  %v1557_v38 = vld [vmem:[%s2041_s0 + $0xa0] ss:$8 sps:$4 sm:$0xff]   ;;  %v676_v41 = vld [vmem:[%s2042_s2 + $0x58] sm:$0xff]  ;;  %v675_v42 = vld [vmem:[%s2042_s2 + $0x50] sm:$0xff] }
   0xf   :  { %1399 = vmatpush3.bf16.msra.mxu0 %v1531_v8  ;;  %1515 = vmatpush3.bf16.msra.mxu1 %v1531_v8  ;;  %v678_v43 = vld [vmem:[%s2042_s2 + $0x68] sm:$0xff]  ;;  %v677_v44 = vld [vmem:[%s2042_s2 + $0x60] sm:$0xff]  ;;  %v1562_v45 = vld [vmem:[%s2041_s0 + $0x30] ss:$8 sps:$4 sm:$0xff]  }
  0x10   :  { %1400 = vmatprep.subr.bf16.mxu0 %v1532_v9  ;;  %1508 = vmatprep.subr.bf16.mxu1 %v1532_v9  ;;  %v1563_v46 = vld [vmem:[%s2041_s0 + $0xb0] ss:$8 sps:$4 sm:$0xff]   ;;  %v1564_v47 = vld [vmem:[%s2041_s0 + $0x44] ss:$8 sps:$4 sm:$0xff]   ;;  %v1568_v53 = vld [vmem:[%s2041_s0 + $0x40] ss:$8 sps:$4 sm:$0xff]  }
  0x11   :  { %724 = vperm.xlu1 %1523, %v670_v28   ;;  %v1566_v48 = vld [vmem:[%s2041_s0 + $0xc4] ss:$8 sps:$4 sm:$0xff]   ;;  %v680_v49 = vld [vmem:[%s2042_s2 + $0x78] sm:$0xff]  ;;  %v679_v50 = vld [vmem:[%s2042_s2 + $0x70] sm:$0xff] }
  0x12   :  { %719 = vperm.xlu0 %1522, %v669_v29   ;;  %v682_v51 = vld [vmem:[%s2042_s2 + $0x88] sm:$0xff]  ;;  %v681_v52 = vld [vmem:[%s2042_s2 + $0x80] sm:$0xff]  ;;  %v1570_v55 = vld [vmem:[%s2041_s0 + $0x54] ss:$8 sps:$4 sm:$0xff]  }
  0x13   :  { %1401 = vmatpush3.bf16.msra.mxu0 %v1533_v10  ;;  %1516 = vmatpush3.bf16.msra.mxu1 %v1533_v10  ;;  %v1569_v54 = vld [vmem:[%s2041_s0 + $0xc0] ss:$8 sps:$4 sm:$0xff]   ;;  %v1572_v56 = vld [vmem:[%s2041_s0 + $0xd4] ss:$8 sps:$4 sm:$0xff]   ;;  %v1574_v61 = vld [vmem:[%s2041_s0 + $0x50] ss:$8 sps:$4 sm:$0xff]  }
  0x14   :  { %1402 = vmatprep.subr.bf16.mxu0 %v1534_v11  ;;  %1509 = vmatprep.subr.bf16.mxu1 %v1534_v11  ;;  %v684_v57 = vld [vmem:[%s2042_s2 + $0x98] sm:$0xff]  ;;  %v683_v58 = vld [vmem:[%s2042_s2 + $0x90] sm:$0xff]  ;;  %v686_v59 = vld [vmem:[%s2042_s2 + $0xa8] sm:$0xff] }
  0x15   :  { %734 = vperm.xlu1 %1523, %v672_v33   ;;  %v685_v60 = vld [vmem:[%s2042_s2 + $0xa0] sm:$0xff]  ;;  %v1575_v62 = vld [vmem:[%s2041_s0 + $0xd0] ss:$8 sps:$4 sm:$0xff]   ;;  %v690_v3 = vld [vmem:[%s2042_s2 + $0xc8] sm:$0xff] }
  0x16   :  { %729 = vperm.xlu0 %1522, %v671_v34   ;;  %v1576_v63 = vld [vmem:[%s2041_s0 + $0x64] ss:$8 sps:$4 sm:$0xff]   ;;  %v688_v1 = vld [vmem:[%s2042_s2 + $0xb8] sm:$0xff]  ;;  %v687_v2 = vld [vmem:[%s2042_s2 + $0xb0] sm:$0xff] }
  0x17   :  { %1403 = vmatpush3.bf16.msra.mxu0 %v1535_v14  ;;  %1517 = vmatpush3.bf16.msra.mxu1 %v1535_v14  ;;  %v1578_v0 = vld [vmem:[%s2041_s0 + $0xe4] ss:$8 sps:$4 sm:$0xff]   ;;  %v1580_v5 = vld [vmem:[%s2041_s0 + $0x60] ss:$8 sps:$4 sm:$0xff]   ;;  %v1582_v7 = vld [vmem:[%s2041_s0 + $0x74] ss:$8 sps:$4 sm:$0xff]  }
  0x18   :  { %1404 = vmatprep.subr.bf16.mxu0 %v1536_v15  ;;  %1510 = vmatprep.subr.bf16.mxu1 %v1536_v15  ;;  %v689_v4 = vld [vmem:[%s2042_s2 + $0xc0] sm:$0xff]  ;;  %v1584_v8 = vld [vmem:[%s2041_s0 + $0xf4] ss:$8 sps:$4 sm:$0xff]   ;;  %v694_v11 = vld [vmem:[%s2042_s2 + $0xe8] sm:$0xff] }
  0x19   :  { %744 = vperm.xlu1 %1523, %v674_v35   ;;  %v1581_v6 = vld [vmem:[%s2041_s0 + $0xe0] ss:$8 sps:$4 sm:$0xff]   ;;  %v692_v9 = vld [vmem:[%s2042_s2 + $0xd8] sm:$0xff]  ;;  %v691_v10 = vld [vmem:[%s2042_s2 + $0xd0] sm:$0xff] }
  0x1a   :  { %739 = vperm.xlu0 %1522, %v673_v36   ;;  %v693_v12 = vld [vmem:[%s2042_s2 + $0xe0] sm:$0xff]  ;;  %v1586_v13 = vld [vmem:[%s2041_s0 + $0x70] ss:$8 sps:$4 sm:$0xff]  }
  0x1b   :  { %1405 = vmatpush3.bf16.msra.mxu0 %v1537_v16  ;;  %1518 = vmatpush3.bf16.msra.mxu1 %v1537_v16  ;;  %v1587_v14 = vld [vmem:[%s2041_s0 + $0xf0] ss:$8 sps:$4 sm:$0xff]  }
  0x1c   :  { %1406 = vmatprep.subr.bf16.mxu0 %v1538_v17  ;;  %1511 = vmatprep.subr.bf16.mxu1 %v1538_v17  ;;  %v696_v15 = vld [vmem:[%s2042_s2 + $0xf8] sm:$0xff]  ;;  %v695_v16 = vld [vmem:[%s2042_s2 + $0xf0] sm:$0xff] }
  0x1d   :  { %754 = vperm.xlu1 %1523, %v676_v41  }
  0x1e   :  { %749 = vperm.xlu0 %1522, %v675_v42  }
  0x1f   :  { %1407 = vmatpush3.bf16.msra.mxu0 %v1539_v18  ;;  %1519 = vmatpush3.bf16.msra.mxu1 %v1539_v18 }
  0x21   :  { %764 = vperm.xlu1 %1523, %v678_v43  }
  0x22   :  { %438 = vmatmul.mubr.bf16.vlgmr.msra.gmra.mrb[0].mxu0 %v1540_v19  ;;  %502 = vmatmul.mubr.bf16.vlgmr.msra.gmra.mrb[0].mxu1 %v1543_v22 }
  0x23   :  { %445 = vmatprep.mubr.bf16.mxu0 %v1546_v23  ;;  %509 = vmatprep.mubr.bf16.mxu1 %v1548_v24 }
  0x24   :  { %759 = vperm.xlu0 %1522, %v677_v44  }
  0x25   :  { %774 = vperm.xlu1 %1523, %v680_v49  }
  0x28   :  { %769 = vperm.xlu0 %1522, %v679_v50  }
  0x29   :  { %784 = vperm.xlu1 %1523, %v682_v51  }
  0x2a   :  { %446 = vmatmul.mubr.bf16.gmra.mrb[4].mxu0 %v1550_v27  ;;  %510 = vmatmul.mubr.bf16.gmra.mrb[4].mxu1 %v1551_v30 }
  0x2b   :  { %453 = vmatprep.mubr.bf16.mxu0 %v1552_v31  ;;  %517 = vmatprep.mubr.bf16.mxu1 %v1554_v32 }
  0x2c   :  { %779 = vperm.xlu0 %1522, %v681_v52  }
  0x2d   :  { %794 = vperm.xlu1 %1523, %v684_v57  }
  0x30   :  { %789 = vperm.xlu0 %1522, %v683_v58  }
  0x31   :  { %804 = vperm.xlu1 %1523, %v686_v59  }
  0x32   :  { %454 = vmatmul.mubr.bf16.gmra.mrb[8].mxu0 %v1556_v37  ;;  %518 = vmatmul.mubr.bf16.gmra.mrb[8].mxu1 %v1557_v38 }
  0x33   :  { %461 = vmatprep.mubr.bf16.mxu0 %v1558_v39  ;;  %525 = vmatprep.mubr.bf16.mxu1 %v1560_v40 }
  0x34   :  { %799 = vperm.xlu0 %1522, %v685_v60  }
  0x35   :  { %814 = vperm.xlu1 %1523, %v688_v1  }
  0x38   :  { %809 = vperm.xlu0 %1522, %v687_v2  }
  0x39   :  { %824 = vperm.xlu1 %1523, %v690_v3  }
  0x3a   :  { %462 = vmatmul.mubr.bf16.gmra.mrb[12].mxu0 %v1562_v45  ;;  %526 = vmatmul.mubr.bf16.gmra.mrb[12].mxu1 %v1563_v46 }
  0x3b   :  { %469 = vmatprep.mubr.bf16.mxu0 %v1564_v47  ;;  %533 = vmatprep.mubr.bf16.mxu1 %v1566_v48 }
  0x3c   :  { %819 = vperm.xlu0 %1522, %v689_v4  }
  0x3d   :  { %834 = vperm.xlu1 %1523, %v692_v9  }
  0x40   :  { %829 = vperm.xlu0 %1522, %v691_v10  }
  0x41   :  { %844 = vperm.xlu1 %1523, %v694_v11  }
  0x42   :  { %470 = vmatmul.mubr.bf16.gmra.mrb[16].mxu0 %v1568_v53  ;;  %534 = vmatmul.mubr.bf16.gmra.mrb[16].mxu1 %v1569_v54 }
  0x43   :  { %477 = vmatprep.mubr.bf16.mxu0 %v1570_v55  ;;  %541 = vmatprep.mubr.bf16.mxu1 %v1572_v56 }
  0x44   :  { %839 = vperm.xlu0 %1522, %v693_v12  }
  0x45   :  { %854 = vperm.xlu1 %1523, %v696_v15  }
  0x48   :  { %849 = vperm.xlu0 %1522, %v695_v16  }
  0x4a   :  { %478 = vmatmul.mubr.bf16.gmra.mrb[20].mxu0 %v1574_v61  ;;  %542 = vmatmul.mubr.bf16.gmra.mrb[20].mxu1 %v1575_v62 }
  0x4b   :  { %485 = vmatprep.mubr.bf16.mxu0 %v1576_v63  ;;  %549 = vmatprep.mubr.bf16.mxu1 %v1578_v0 }
  0x52   :  { %486 = vmatmul.mubr.bf16.gmra.mrb[24].mxu0 %v1580_v5  ;;  %550 = vmatmul.mubr.bf16.gmra.mrb[24].mxu1 %v1581_v6 }
  0x53   :  { %493 = vmatprep.mubr.bf16.mxu0 %v1582_v7  ;;  %557 = vmatprep.mubr.bf16.mxu1 %v1584_v8 }
  0x5a   :  { %494 = vmatmul.mubr.bf16.gmra.mrb[28].mxu0 %v1586_v13  ;;  %558 = vmatmul.mubr.bf16.gmra.mrb[28].mxu1 %v1587_v14 }
  0x88   :  { %v1854_v17 = vpop.permute.xlu1 %709 }
  0x89   :  { %v700_v18 = vpop.permute.xlu0 %699 }
  0x8c   :  { %v1856_v19 = vpop.permute.xlu1 %714 }
  0x8d   :  { %v705_v20 = vpop.permute.xlu0 %704 }
  0x90   :  { %v1858_v21 = vpop.permute.xlu1 %724 }
  0x91   :  { %v1860_v22 = vpop.permute.xlu0 %719 }
  0x94   :  { %v1862_v23 = vpop.permute.xlu1 %734 }
  0x95   :  { %v1864_v24 = vpop.permute.xlu0 %729 }
  0x98   :  { %v1866_v25 = vpop.permute.xlu1 %744 }
  0x99   :  { %v1868_v26 = vpop.permute.xlu0 %739 }
  0x9c   :  { %v1870_v27 = vpop.permute.xlu1 %754 }
  0x9d   :  { %v1872_v28 = vpop.permute.xlu0 %749 }
  0xa0   :  { %v1874_v29 = vpop.permute.xlu1 %764 }
  0xa3   :  { %v1876_v30 = vpop.permute.xlu0 %759 }
  0xa4   :  { %v1878_v31 = vpop.permute.xlu1 %774 }
  0xa7   :  { %v1880_v32 = vpop.permute.xlu0 %769 }
  0xa8   :  { %v785_v48 = vpop.permute.xlu1 %784 }
  0xab   :  { %v780_v45 = vpop.permute.xlu0 %779 }
  0xac   :  { %v795_v16 = vpop.permute.xlu1 %794 }
  0xaf   :  { %v790_v7 = vpop.permute.xlu0 %789 }
  0xf5   :  { %v1408_v33 = vpop.f32.mrb[0].mxu0  ;;  %v1456_v34 = vpop.f32.mrb[0].mxu1 }
  0xf6   :  { %v1409_v35 = vpop.f32.mrb[1].mxu0  ;;  %v1457_v36 = vpop.f32.mrb[1].mxu1 }
  0xf7   :  { %v1410_v37 = vadd.f32 %v1409_v35, %v1408_v33  ;;  %v1458_v38 = vadd.f32 %v1457_v36, %v1456_v34  ;;  %v1411_v39 = vpop.f32.mrb[2].mxu0  ;;  %v1459_v40 = vpop.f32.mrb[2].mxu1 }
  0xf8   :  { %v1412_v41 = vpop.f32.mrb[3].mxu0  ;;  %v1460_v42 = vpop.f32.mrb[3].mxu1 }
  0xf9   :  { %v1413_v43 = vadd.f32 %v1412_v41, %v1411_v39  ;;  %v1461_v44 = vadd.f32 %v1460_v42, %v1459_v40  ;;  %v857_v46 = vmul.f32 %v1410_v37, %v700_v18  ;;  %v873_v47 = vmul.f32 %v1458_v38, %v780_v45  ;;  %v800_v45 = vpop.permute.xlu0 %799 }
  0xfb   :  { %vm889_vm0 = vcmp.gt.f32.partialorder %v857_v46, 0.0  ;;  %v921_v49 = vmul.f32 0.01, %v857_v46  ;;  %vm905_vm1 = vcmp.gt.f32.partialorder %v873_v47, 0.0  ;;  %v937_v50 = vmul.f32 0.01, %v873_v47 }
  0xfc   :  { %v858_v51 = vmul.f32 %v1413_v43, %v705_v20  ;;  %v874_v52 = vmul.f32 %v1461_v44, %v785_v48 }
  0xfd   :  { %v1414_v53 = vpop.f32.mrb[4].mxu0  ;;  %v1462_v54 = vpop.f32.mrb[4].mxu1  ;;  %v953_v55 = vsel %vm889_vm0, %v857_v46, %v921_v49  ;;  %v969_v56 = vsel %vm905_vm1, %v873_v47, %v937_v50 }
  0xfe   :  { %v1415_v57 = vpop.f32.mrb[5].mxu0  ;;  %v1463_v58 = vpop.f32.mrb[5].mxu1  ;;  %985 = vst [vmem:[%s2043_s3] sm:$0xff] %v953_v55  ;;  %1001 = vst [vmem:[%s2043_s3 + $0x80] sm:$0xff] %v969_v56  ;;  %vm890_vm2 = vcmp.gt.f32.partialorder %v858_v51, 0.0  ;;  %v922_v59 = vmul.f32 0.01, %v858_v51 }
  0xff   :  { %vm906_vm3 = vcmp.gt.f32.partialorder %v874_v52, 0.0  ;;  %v938_v60 = vmul.f32 0.01, %v874_v52  ;;  %v1416_v61 = vadd.f32 %v1415_v57, %v1414_v53  ;;  %v1464_v62 = vadd.f32 %v1463_v58, %v1462_v54  ;;  %v1417_v63 = vpop.f32.mrb[6].mxu0  ;;  %v1465_v0 = vpop.f32.mrb[6].mxu1 }
 0x100   :  { %v954_v1 = vsel %vm890_vm2, %v858_v51, %v922_v59  ;;  %v1418_v3 = vpop.f32.mrb[7].mxu0  ;;  %v1466_v4 = vpop.f32.mrb[7].mxu1 }
 0x101   :  { %v970_v2 = vsel %vm906_vm3, %v874_v52, %v938_v60  ;;  %986 = vst [vmem:[%s2043_s3 + $0x8] sm:$0xff] %v954_v1  ;;  %v1300_v5 = vpack.c.bf16 %v954_v1, %v953_v55  ;;  %v1419_v8 = vadd.f32 %v1418_v3, %v1417_v63  ;;  %v1467_v9 = vadd.f32 %v1466_v4, %v1465_v0 }
 0x102   :  { %1002 = vst [vmem:[%s2043_s3 + $0x88] sm:$0xff] %v970_v2  ;;  %v1340_v6 = vpack.c.bf16 %v970_v2, %v969_v56  ;;  %v859_v10 = vmul.f32 %v1416_v61, %v1854_v17  ;;  %v875_v11 = vmul.f32 %v1464_v62, %v790_v7  ;;  %v805_v56 = vpop.permute.xlu1 %804  ;;  %v810_v7 = vpop.permute.xlu0 %809 }
 0x103   :  { %1301 = vst [vmem:[%s2044_s4] sm:$0xff] %v1300_v5   ;;  %v860_v33 = vmul.f32 %v1419_v8, %v1856_v19  ;;  %v876_v34 = vmul.f32 %v1467_v9, %v795_v16 }
 0x104   :  { %1384 = vst [vmem:[%s2044_s4 + $0x40] sm:$0xff] %v1340_v6   ;;  %vm891_vm4 = vcmp.gt.f32.partialorder %v859_v10, 0.0  ;;  %v923_v18 = vmul.f32 0.01, %v859_v10  ;;  %vm907_vm5 = vcmp.gt.f32.partialorder %v875_v11, 0.0 }
 0x105   :  { %v1420_v12 = vpop.f32.mrb[8].mxu0  ;;  %v1468_v13 = vpop.f32.mrb[8].mxu1  ;;  %v939_v20 = vmul.f32 0.01, %v875_v11  ;;  %vm892_vm6 = vcmp.gt.f32.partialorder %v860_v33, 0.0  ;;  %vm908_vm7 = vcmp.gt.f32.partialorder %v876_v34, 0.0 }
 0x106   :  { %v1421_v14 = vpop.f32.mrb[9].mxu0  ;;  %v1469_v15 = vpop.f32.mrb[9].mxu1  ;;  %v955_v39 = vsel %vm891_vm4, %v859_v10, %v923_v18  ;;  %v924_v42 = vmul.f32 0.01, %v860_v33  ;;  %v940_v19 = vmul.f32 0.01, %v876_v34 }
 0x107   :  { %v1422_v35 = vadd.f32 %v1421_v14, %v1420_v12  ;;  %v1470_v36 = vadd.f32 %v1469_v15, %v1468_v13  ;;  %v1423_v37 = vpop.f32.mrb[10].mxu0  ;;  %v1471_v38 = vpop.f32.mrb[10].mxu1  ;;  %v971_v40 = vsel %vm907_vm5, %v875_v11, %v939_v20  ;;  %987 = vst [vmem:[%s2043_s3 + $0x10] sm:$0xff] %v955_v39 }
 0x108   :  { %v1424_v17 = vpop.f32.mrb[11].mxu0  ;;  %v1472_v41 = vpop.f32.mrb[11].mxu1  ;;  %1003 = vst [vmem:[%s2043_s3 + $0x90] sm:$0xff] %v971_v40  ;;  %v956_v46 = vsel %vm892_vm6, %v860_v33, %v924_v42  ;;  %v972_v47 = vsel %vm908_vm7, %v876_v34, %v940_v19 }
 0x109   :  { %v1425_v43 = vadd.f32 %v1424_v17, %v1423_v37  ;;  %v1473_v44 = vadd.f32 %v1472_v41, %v1471_v38  ;;  %988 = vst [vmem:[%s2043_s3 + $0x18] sm:$0xff] %v956_v46  ;;  %v1305_v48 = vpack.c.bf16 %v956_v46, %v955_v39  ;;  %1004 = vst [vmem:[%s2043_s3 + $0x98] sm:$0xff] %v972_v47  ;;  %v815_v20 = vpop.permute.xlu1 %814 }
 0x10a   :  { %v1345_v49 = vpack.c.bf16 %v972_v47, %v971_v40  ;;  %v861_v50 = vmul.f32 %v1422_v35, %v1860_v22  ;;  %v877_v51 = vmul.f32 %v1470_v36, %v800_v45  ;;  %v820_v45 = vpop.permute.xlu0 %819 }
 0x10b   :  { %1377 = vst [vmem:[%s2044_s4 + $0x8] sm:$0xff] %v1305_v48   ;;  %v862_v22 = vmul.f32 %v1425_v43, %v1858_v21  ;;  %v878_v59 = vmul.f32 %v1473_v44, %v805_v56 }
 0x10c   :  { %1385 = vst [vmem:[%s2044_s4 + $0x48] sm:$0xff] %v1345_v49   ;;  %vm893_vm8 = vcmp.gt.f32.partialorder %v861_v50, 0.0  ;;  %v925_v57 = vmul.f32 0.01, %v861_v50  ;;  %vm909_vm9 = vcmp.gt.f32.partialorder %v877_v51, 0.0 }
 0x10d   :  { %v1426_v52 = vpop.f32.mrb[12].mxu0  ;;  %v1474_v53 = vpop.f32.mrb[12].mxu1  ;;  %v941_v58 = vmul.f32 0.01, %v877_v51  ;;  %vm894_vm10 = vcmp.gt.f32.partialorder %v862_v22, 0.0  ;;  %vm910_vm11 = vcmp.gt.f32.partialorder %v878_v59, 0.0 }
 0x10e   :  { %v1427_v54 = vpop.f32.mrb[13].mxu0  ;;  %v1475_v55 = vpop.f32.mrb[13].mxu1  ;;  %v957_v0 = vsel %vm893_vm8, %v861_v50, %v925_v57  ;;  %v926_v4 = vmul.f32 0.01, %v862_v22  ;;  %v942_v21 = vmul.f32 0.01, %v878_v59 }
 0x10f   :  { %v1428_v60 = vadd.f32 %v1427_v54, %v1426_v52  ;;  %v1476_v61 = vadd.f32 %v1475_v55, %v1474_v53  ;;  %v1429_v62 = vpop.f32.mrb[14].mxu0  ;;  %v1477_v63 = vpop.f32.mrb[14].mxu1  ;;  %v973_v1 = vsel %vm909_vm9, %v877_v51, %v941_v58  ;;  %989 = vst [vmem:[%s2043_s3 + $0x20] sm:$0xff] %v957_v0 }
 0x110   :  { %v1430_v2 = vpop.f32.mrb[15].mxu0  ;;  %v1478_v3 = vpop.f32.mrb[15].mxu1  ;;  %1005 = vst [vmem:[%s2043_s3 + $0xa0] sm:$0xff] %v973_v1  ;;  %v958_v8 = vsel %vm894_vm10, %v862_v22, %v926_v4  ;;  %v974_v9 = vsel %vm910_vm11, %v878_v59, %v942_v21 }
 0x111   :  { %v1431_v5 = vadd.f32 %v1430_v2, %v1429_v62  ;;  %v1479_v6 = vadd.f32 %v1478_v3, %v1477_v63  ;;  %990 = vst [vmem:[%s2043_s3 + $0x28] sm:$0xff] %v958_v8  ;;  %v1310_v10 = vpack.c.bf16 %v958_v8, %v957_v0  ;;  %1006 = vst [vmem:[%s2043_s3 + $0xa8] sm:$0xff] %v974_v9  ;;  %v825_v56 = vpop.permute.xlu1 %824 }
 0x112   :  { %v1350_v11 = vpack.c.bf16 %v974_v9, %v973_v1  ;;  %v863_v12 = vmul.f32 %v1428_v60, %v1864_v24  ;;  %v879_v13 = vmul.f32 %v1476_v61, %v810_v7 }
 0x113   :  { %1378 = vst [vmem:[%s2044_s4 + $0x10] sm:$0xff] %v1310_v10   ;;  %v864_v24 = vmul.f32 %v1431_v5, %v1862_v23  ;;  %v880_v35 = vmul.f32 %v1479_v6, %v815_v20  ;;  %v830_v5 = vpop.permute.xlu0 %829 }
 0x114   :  { %1386 = vst [vmem:[%s2044_s4 + $0x50] sm:$0xff] %v1350_v11   ;;  %vm895_vm12 = vcmp.gt.f32.partialorder %v863_v12, 0.0  ;;  %v927_v33 = vmul.f32 0.01, %v863_v12  ;;  %vm911_vm13 = vcmp.gt.f32.partialorder %v879_v13, 0.0 }
 0x115   :  { %v1432_v14 = vpop.f32.mrb[16].mxu0  ;;  %v1480_v15 = vpop.f32.mrb[16].mxu1  ;;  %v943_v34 = vmul.f32 0.01, %v879_v13  ;;  %vm896_vm14 = vcmp.gt.f32.partialorder %v864_v24, 0.0  ;;  %vm912_vm15 = vcmp.gt.f32.partialorder %v880_v35, 0.0 }
 0x116   :  { %v1433_v16 = vpop.f32.mrb[17].mxu0  ;;  %v1481_v18 = vpop.f32.mrb[17].mxu1  ;;  %v959_v40 = vsel %vm895_vm12, %v863_v12, %v927_v33  ;;  %v928_v19 = vmul.f32 0.01, %v864_v24  ;;  %v944_v23 = vmul.f32 0.01, %v880_v35 }
 0x117   :  { %v1434_v36 = vadd.f32 %v1433_v16, %v1432_v14  ;;  %v1482_v37 = vadd.f32 %v1481_v18, %v1480_v15  ;;  %v1435_v38 = vpop.f32.mrb[18].mxu0  ;;  %v1483_v39 = vpop.f32.mrb[18].mxu1  ;;  %v975_v17 = vsel %vm911_vm13, %v879_v13, %v943_v34  ;;  %991 = vst [vmem:[%s2043_s3 + $0x30] sm:$0xff] %v959_v40 }
 0x118   :  { %v1436_v41 = vpop.f32.mrb[19].mxu0  ;;  %v1484_v42 = vpop.f32.mrb[19].mxu1  ;;  %1007 = vst [vmem:[%s2043_s3 + $0xb0] sm:$0xff] %v975_v17  ;;  %v960_v46 = vsel %vm896_vm14, %v864_v24, %v928_v19  ;;  %v976_v47 = vsel %vm912_vm15, %v880_v35, %v944_v23 }
 0x119   :  { %v1437_v43 = vadd.f32 %v1436_v41, %v1435_v38  ;;  %v1485_v44 = vadd.f32 %v1484_v42, %v1483_v39  ;;  %992 = vst [vmem:[%s2043_s3 + $0x38] sm:$0xff] %v960_v46  ;;  %v1315_v48 = vpack.c.bf16 %v960_v46, %v959_v40  ;;  %1008 = vst [vmem:[%s2043_s3 + $0xb8] sm:$0xff] %v976_v47  ;;  %v835_v16 = vpop.permute.xlu1 %834  ;;  %v840_v19 = vpop.permute.xlu0 %839 }
 0x11a   :  { %v1355_v49 = vpack.c.bf16 %v976_v47, %v975_v17  ;;  %v865_v50 = vmul.f32 %v1434_v36, %v1868_v26  ;;  %v881_v51 = vmul.f32 %v1482_v37, %v820_v45 }
 0x11b   :  { %1379 = vst [vmem:[%s2044_s4 + $0x18] sm:$0xff] %v1315_v48   ;;  %v866_v26 = vmul.f32 %v1437_v43, %v1866_v25  ;;  %v882_v22 = vmul.f32 %v1485_v44, %v825_v56 }
 0x11c   :  { %1387 = vst [vmem:[%s2044_s4 + $0x58] sm:$0xff] %v1355_v49   ;;  %vm897_vm0 = vcmp.gt.f32.partialorder %v865_v50, 0.0  ;;  %v929_v57 = vmul.f32 0.01, %v865_v50  ;;  %vm913_vm1 = vcmp.gt.f32.partialorder %v881_v51, 0.0 }
 0x11d   :  { %v1438_v52 = vpop.f32.mrb[20].mxu0  ;;  %v1486_v53 = vpop.f32.mrb[20].mxu1  ;;  %v945_v58 = vmul.f32 0.01, %v881_v51  ;;  %vm898_vm2 = vcmp.gt.f32.partialorder %v866_v26, 0.0  ;;  %vm914_vm3 = vcmp.gt.f32.partialorder %v882_v22, 0.0 }
 0x11e   :  { %v1439_v54 = vpop.f32.mrb[21].mxu0  ;;  %v1487_v55 = vpop.f32.mrb[21].mxu1  ;;  %v961_v63 = vsel %vm897_vm0, %v865_v50, %v929_v57  ;;  %v930_v3 = vmul.f32 0.01, %v866_v26  ;;  %v946_v25 = vmul.f32 0.01, %v882_v22 }
 0x11f   :  { %v1440_v59 = vadd.f32 %v1439_v54, %v1438_v52  ;;  %v1488_v60 = vadd.f32 %v1487_v55, %v1486_v53  ;;  %v1441_v61 = vpop.f32.mrb[22].mxu0  ;;  %v1489_v62 = vpop.f32.mrb[22].mxu1  ;;  %v977_v0 = vsel %vm913_vm1, %v881_v51, %v945_v58  ;;  %993 = vst [vmem:[%s2043_s3 + $0x40] sm:$0xff] %v961_v63 }
 0x120   :  { %v1442_v1 = vpop.f32.mrb[23].mxu0  ;;  %v1490_v2 = vpop.f32.mrb[23].mxu1  ;;  %1009 = vst [vmem:[%s2043_s3 + $0xc0] sm:$0xff] %v977_v0  ;;  %v962_v6 = vsel %vm898_vm2, %v866_v26, %v930_v3  ;;  %v978_v7 = vsel %vm914_vm3, %v882_v22, %v946_v25 }
 0x121   :  { %v1443_v4 = vadd.f32 %v1442_v1, %v1441_v61  ;;  %v1491_v21 = vadd.f32 %v1490_v2, %v1489_v62  ;;  %994 = vst [vmem:[%s2043_s3 + $0x48] sm:$0xff] %v962_v6  ;;  %v1320_v8 = vpack.c.bf16 %v962_v6, %v961_v63  ;;  %1010 = vst [vmem:[%s2043_s3 + $0xc8] sm:$0xff] %v978_v7  ;;  %v845_v52 = vpop.permute.xlu1 %844  ;;  %v850_v1 = vpop.permute.xlu0 %849 }
 0x122   :  { %v1360_v9 = vpack.c.bf16 %v978_v7, %v977_v0  ;;  %v867_v10 = vmul.f32 %v1440_v59, %v1872_v28  ;;  %v883_v11 = vmul.f32 %v1488_v60, %v830_v5 }
 0x123   :  { %1380 = vst [vmem:[%s2044_s4 + $0x20] sm:$0xff] %v1320_v8   ;;  %v868_v28 = vmul.f32 %v1443_v4, %v1870_v27  ;;  %v884_v33 = vmul.f32 %v1491_v21, %v835_v16 }
 0x124   :  { %1388 = vst [vmem:[%s2044_s4 + $0x60] sm:$0xff] %v1360_v9   ;;  %vm899_vm4 = vcmp.gt.f32.partialorder %v867_v10, 0.0  ;;  %v931_v18 = vmul.f32 0.01, %v867_v10  ;;  %vm915_vm5 = vcmp.gt.f32.partialorder %v883_v11, 0.0 }
 0x125   :  { %v1444_v12 = vpop.f32.mrb[24].mxu0  ;;  %v1492_v13 = vpop.f32.mrb[24].mxu1  ;;  %v947_v20 = vmul.f32 0.01, %v883_v11  ;;  %vm900_vm6 = vcmp.gt.f32.partialorder %v868_v28, 0.0  ;;  %vm916_vm7 = vcmp.gt.f32.partialorder %v884_v33, 0.0 }
 0x126   :  { %v1445_v14 = vpop.f32.mrb[25].mxu0  ;;  %v1493_v15 = vpop.f32.mrb[25].mxu1  ;;  %v963_v37 = vsel %vm899_vm4, %v867_v10, %v931_v18  ;;  %v932_v17 = vmul.f32 0.01, %v868_v28  ;;  %v948_v27 = vmul.f32 0.01, %v884_v33 }
 0x127   :  { %v1446_v34 = vadd.f32 %v1445_v14, %v1444_v12  ;;  %v1494_v24 = vadd.f32 %v1493_v15, %v1492_v13  ;;  %v1447_v35 = vpop.f32.mrb[26].mxu0  ;;  %v1495_v36 = vpop.f32.mrb[26].mxu1  ;;  %v979_v38 = vsel %vm915_vm5, %v883_v11, %v947_v20  ;;  %995 = vst [vmem:[%s2043_s3 + $0x50] sm:$0xff] %v963_v37 }
 0x128   :  { %v1448_v39 = vpop.f32.mrb[27].mxu0  ;;  %v1496_v40 = vpop.f32.mrb[27].mxu1  ;;  %1011 = vst [vmem:[%s2043_s3 + $0xd0] sm:$0xff] %v979_v38  ;;  %v964_v23 = vsel %vm900_vm6, %v868_v28, %v932_v17  ;;  %v980_v43 = vsel %vm916_vm7, %v884_v33, %v948_v27 }
 0x129   :  { %v1449_v41 = vadd.f32 %v1448_v39, %v1447_v35  ;;  %v1497_v42 = vadd.f32 %v1496_v40, %v1495_v36  ;;  %996 = vst [vmem:[%s2043_s3 + $0x58] sm:$0xff] %v964_v23  ;;  %v1325_v44 = vpack.c.bf16 %v964_v23, %v963_v37  ;;  %1012 = vst [vmem:[%s2043_s3 + $0xd8] sm:$0xff] %v980_v43  ;;  %v855_v6 = vpop.permute.xlu1 %854 }
 0x12a   :  { %v1365_v45 = vpack.c.bf16 %v980_v43, %v979_v38  ;;  %v869_v46 = vmul.f32 %v1446_v34, %v1876_v30  ;;  %v885_v47 = vmul.f32 %v1494_v24, %v840_v19 }
 0x12b   :  { %1381 = vst [vmem:[%s2044_s4 + $0x28] sm:$0xff] %v1325_v44   ;;  %v870_v30 = vmul.f32 %v1449_v41, %v1874_v29  ;;  %v886_v55 = vmul.f32 %v1497_v42, %v845_v52 }
 0x12c   :  { %1389 = vst [vmem:[%s2044_s4 + $0x68] sm:$0xff] %v1365_v45   ;;  %vm901_vm8 = vcmp.gt.f32.partialorder %v869_v46, 0.0  ;;  %v933_v53 = vmul.f32 0.01, %v869_v46  ;;  %vm917_vm9 = vcmp.gt.f32.partialorder %v885_v47, 0.0 }
 0x12d   :  { %v1450_v48 = vpop.f32.mrb[28].mxu0  ;;  %v1498_v49 = vpop.f32.mrb[28].mxu1  ;;  %v949_v54 = vmul.f32 0.01, %v885_v47  ;;  %vm902_vm10 = vcmp.gt.f32.partialorder %v870_v30, 0.0  ;;  %vm918_vm11 = vcmp.gt.f32.partialorder %v886_v55, 0.0 }
 0x12e   :  { %v1451_v50 = vpop.f32.mrb[29].mxu0  ;;  %v1499_v51 = vpop.f32.mrb[29].mxu1  ;;  %v965_v22 = vsel %vm901_vm8, %v869_v46, %v933_v53  ;;  %v934_v62 = vmul.f32 0.01, %v870_v30  ;;  %v950_v29 = vmul.f32 0.01, %v886_v55 }
 0x12f   :  { %v1452_v56 = vadd.f32 %v1451_v50, %v1450_v48  ;;  %v1500_v57 = vadd.f32 %v1499_v51, %v1498_v49  ;;  %v1453_v58 = vpop.f32.mrb[30].mxu0  ;;  %v1501_v26 = vpop.f32.mrb[30].mxu1  ;;  %v981_v59 = vsel %vm917_vm9, %v885_v47, %v949_v54  ;;  %997 = vst [vmem:[%s2043_s3 + $0x60] sm:$0xff] %v965_v22 }
 0x130   :  { %v1454_v60 = vpop.f32.mrb[31].mxu0  ;;  %v1502_v61 = vpop.f32.mrb[31].mxu1  ;;  %1013 = vst [vmem:[%s2043_s3 + $0xe0] sm:$0xff] %v981_v59  ;;  %v966_v2 = vsel %vm902_vm10, %v870_v30, %v934_v62  ;;  %v982_v3 = vsel %vm918_vm11, %v886_v55, %v950_v29 }
 0x131   :  { %v1455_v63 = vadd.f32 %v1454_v60, %v1453_v58  ;;  %v1503_v0 = vadd.f32 %v1502_v61, %v1501_v26  ;;  %998 = vst [vmem:[%s2043_s3 + $0x68] sm:$0xff] %v966_v2  ;;  %v1330_v25 = vpack.c.bf16 %v966_v2, %v965_v22  ;;  %1014 = vst [vmem:[%s2043_s3 + $0xe8] sm:$0xff] %v982_v3 }
 0x132   :  { %v1370_v4 = vpack.c.bf16 %v982_v3, %v981_v59  ;;  %v871_v21 = vmul.f32 %v1452_v56, %v1880_v32  ;;  %v887_v5 = vmul.f32 %v1500_v57, %v850_v1 }
 0x133   :  { %1382 = vst [vmem:[%s2044_s4 + $0x30] sm:$0xff] %v1330_v25   ;;  %v872_v9 = vmul.f32 %v1455_v63, %v1878_v31  ;;  %v888_v10 = vmul.f32 %v1503_v0, %v855_v6 }
 0x134   :  { %1390 = vst [vmem:[%s2044_s4 + $0x70] sm:$0xff] %v1370_v4   ;;  %vm903_vm12 = vcmp.gt.f32.partialorder %v871_v21, 0.0  ;;  %v935_v7 = vmul.f32 0.01, %v871_v21  ;;  %vm919_vm13 = vcmp.gt.f32.partialorder %v887_v5, 0.0 }
 0x135   :  { %v951_v8 = vmul.f32 0.01, %v887_v5  ;;  %vm904_vm14 = vcmp.gt.f32.partialorder %v872_v9, 0.0  ;;  %v936_v32 = vmul.f32 0.01, %v872_v9  ;;  %vm920_vm15 = vcmp.gt.f32.partialorder %v888_v10, 0.0 }
 0x136   :  { %v967_v11 = vsel %vm903_vm12, %v871_v21, %v935_v7  ;;  %v952_v13 = vmul.f32 0.01, %v888_v10 }
 0x137   :  { %v983_v12 = vsel %vm919_vm13, %v887_v5, %v951_v8  ;;  %999 = vst [vmem:[%s2043_s3 + $0x70] sm:$0xff] %v967_v11  ;;  %v968_v14 = vsel %vm904_vm14, %v872_v9, %v936_v32 }
 0x138   :  { %1015 = vst [vmem:[%s2043_s3 + $0xf0] sm:$0xff] %v983_v12  ;;  %v984_v15 = vsel %vm920_vm15, %v888_v10, %v952_v13  ;;  %1000 = vst [vmem:[%s2043_s3 + $0x78] sm:$0xff] %v968_v14  ;;  %v1335_v31 = vpack.c.bf16 %v968_v14, %v967_v11 }
 0x139   :  { %1016 = vst [vmem:[%s2043_s3 + $0xf8] sm:$0xff] %v984_v15  ;;  %v1375_v16 = vpack.c.bf16 %v984_v15, %v983_v12 }
 0x13a   :  { %1383 = vst [vmem:[%s2044_s4 + $0x38] sm:$0xff] %v1335_v31  }
 0x13b   :  { %1391 = vst [vmem:[%s2044_s4 + $0x78] sm:$0xff] %v1375_v16  }

// kernel: egcn_apply.11
= control target key start
LH: loop header
LB: loop body
LE: loop exit
PB: predicated region body
PF: predicated region fallthrough
CT: control target
= control target key end

     0   :  { %v1397_v1 = vmov 0   ;;  %s1999_s1 = inlined_call_operand.vmem [shape: bf16[256,128], index: 1, kind: input, shape index: {}]   ;;  %s2000_s0 = inlined_call_operand.vmem [shape: bf16[256,256], index: 0, kind: input, shape index: {}]   ;;  %s2001_s2 = inlined_call_operand.vmem [shape: f32[256,1], index: 2, kind: input, shape index: {}]   ;;  %s2002_s3 = inlined_call_operand.vmem [shape: f32[256,128], index: 3, kind: input, shape index: {}]   ;;  %s2003_s4 = inlined_call_operand.vmem [shape: f32[256,128], index: 4, kind: input, shape index: {}]   ;;  %s2004_s5 = inlined_call_operand.vmem [shape: f32[256,128], index: 5, kind: output, shape index: {}]  }
   0x1   :  { %v1333_v0 = vld [vmem:[%s1999_s1 + $0x40] sm:$0xff]   ;;  %1332 = vset.pattern.permute.xlu1 %v1397_v1  ;;  %1331 = vset.pattern.permute.xlu0 %v1397_v1  ;;  %v1335_v3 = vld [vmem:[%s1999_s1 + $0x48] sm:$0xff]   ;;  %v1337_v5 = vld [vmem:[%s1999_s1 + $0x50] sm:$0xff]  }
   0x2   :  { %v1334_v2 = vld [vmem:[%s1999_s1] sm:$0xff]   ;;  %1201 = vmatprep.subr.bf16.mxu0 %v1333_v0  ;;  %1313 = vmatprep.subr.bf16.mxu1 %v1333_v0  ;;  %v1336_v4 = vld [vmem:[%s1999_s1 + $0x8] sm:$0xff]   ;;  %v1338_v6 = vld [vmem:[%s1999_s1 + $0x10] sm:$0xff]  }
   0x3   :  { %1202 = vmatpush3.bf16.msra.mxu0 %v1334_v2  ;;  %1321 = vmatpush3.bf16.msra.mxu1 %v1334_v2  ;;  %v1339_v7 = vld [vmem:[%s1999_s1 + $0x58] sm:$0xff]   ;;  %v1341_v9 = vld [vmem:[%s1999_s1 + $0x60] sm:$0xff]   ;;  %v1343_v11 = vld [vmem:[%s1999_s1 + $0x68] sm:$0xff]  }
   0x4   :  { %1203 = vmatprep.subr.bf16.mxu0 %v1335_v3  ;;  %1314 = vmatprep.subr.bf16.mxu1 %v1335_v3  ;;  %v1340_v8 = vld [vmem:[%s1999_s1 + $0x18] sm:$0xff]   ;;  %v1342_v10 = vld [vmem:[%s1999_s1 + $0x20] sm:$0xff]   ;;  %v1344_v14 = vld [vmem:[%s1999_s1 + $0x28] sm:$0xff]  }
   0x5   :  { %v1351_v12 = vld [vmem:[%s2000_s0 + $0x4] ss:$8 sps:$4 sm:$0xff]   ;;  %v1345_v15 = vld [vmem:[%s1999_s1 + $0x70] sm:$0xff]   ;;  %v1347_v17 = vld [vmem:[%s1999_s1 + $0x78] sm:$0xff]  }
   0x6   :  { %v1354_v13 = vld [vmem:[%s2000_s0 + $0x84] ss:$8 sps:$4 sm:$0xff]   ;;  %441 = vmatprep.mubr.bf16.mxu0 %v1351_v12  ;;  %v1346_v16 = vld [vmem:[%s1999_s1 + $0x30] sm:$0xff]   ;;  %v1348_v18 = vld [vmem:[%s1999_s1 + $0x38] sm:$0xff]  }
   0x7   :  { %1204 = vmatpush3.bf16.msra.mxu0 %v1336_v4  ;;  %1322 = vmatpush3.bf16.msra.mxu1 %v1336_v4  ;;  %v1349_v19 = vld [vmem:[%s2000_s0] ss:$8 sps:$4 sm:$0xff]   ;;  %v671_v20 = vld [vmem:[%s2001_s2 + $0x10] sm:$0xff]  ;;  %v672_v25 = vld [vmem:[%s2001_s2 + $0x18] sm:$0xff] }
   0x8   :  { %1205 = vmatprep.subr.bf16.mxu0 %v1337_v5  ;;  %1315 = vmatprep.subr.bf16.mxu1 %v1337_v5  ;;  %v669_v21 = vld [vmem:[%s2001_s2] sm:$0xff]  ;;  %v1355_v23 = vld [vmem:[%s2000_s0 + $0x14] ss:$8 sps:$4 sm:$0xff]   ;;  %v670_v26 = vld [vmem:[%s2001_s2 + $0x8] sm:$0xff] }
   0x9   :  { %505 = vmatprep.mubr.bf16.mxu1 %v1354_v13  ;;  %v1352_v22 = vld [vmem:[%s2000_s0 + $0x80] ss:$8 sps:$4 sm:$0xff]   ;;  %713 = vperm.xlu1 %1332, %v671_v20   ;;  %v1357_v24 = vld [vmem:[%s2000_s0 + $0x94] ss:$8 sps:$4 sm:$0xff]   ;;  %v1359_v27 = vld [vmem:[%s2000_s0 + $0x10] ss:$8 sps:$4 sm:$0xff]  }
   0xa   :  { %703 = vperm.xlu0 %1331, %v669_v21   ;;  %v674_v28 = vld [vmem:[%s2001_s2 + $0x28] sm:$0xff]  ;;  %v673_v29 = vld [vmem:[%s2001_s2 + $0x20] sm:$0xff]  ;;  %v1360_v30 = vld [vmem:[%s2000_s0 + $0x90] ss:$8 sps:$4 sm:$0xff]  }
   0xb   :  { %1206 = vmatpush3.bf16.msra.mxu0 %v1338_v6  ;;  %1323 = vmatpush3.bf16.msra.mxu1 %v1338_v6  ;;  %v1361_v31 = vld [vmem:[%s2000_s0 + $0x24] ss:$8 sps:$4 sm:$0xff]   ;;  %v676_v33 = vld [vmem:[%s2001_s2 + $0x38] sm:$0xff]  ;;  %v675_v34 = vld [vmem:[%s2001_s2 + $0x30] sm:$0xff] }
   0xc   :  { %1207 = vmatprep.subr.bf16.mxu0 %v1339_v7  ;;  %1316 = vmatprep.subr.bf16.mxu1 %v1339_v7  ;;  %v1363_v32 = vld [vmem:[%s2000_s0 + $0xa4] ss:$8 sps:$4 sm:$0xff]   ;;  %v1365_v37 = vld [vmem:[%s2000_s0 + $0x20] ss:$8 sps:$4 sm:$0xff]   ;;  %v1367_v39 = vld [vmem:[%s2000_s0 + $0x34] ss:$8 sps:$4 sm:$0xff]  }
   0xd   :  { %718 = vperm.xlu1 %1332, %v672_v25   ;;  %v678_v35 = vld [vmem:[%s2001_s2 + $0x48] sm:$0xff]  ;;  %v677_v36 = vld [vmem:[%s2001_s2 + $0x40] sm:$0xff]  ;;  %v1369_v40 = vld [vmem:[%s2000_s0 + $0xb4] ss:$8 sps:$4 sm:$0xff]  }
   0xe   :  { %708 = vperm.xlu0 %1331, %v670_v26   ;;  %v1366_v38 = vld [vmem:[%s2000_s0 + $0xa0] ss:$8 sps:$4 sm:$0xff]   ;;  %v680_v41 = vld [vmem:[%s2001_s2 + $0x58] sm:$0xff]  ;;  %v679_v42 = vld [vmem:[%s2001_s2 + $0x50] sm:$0xff] }
   0xf   :  { %1208 = vmatpush3.bf16.msra.mxu0 %v1340_v8  ;;  %1324 = vmatpush3.bf16.msra.mxu1 %v1340_v8  ;;  %v682_v43 = vld [vmem:[%s2001_s2 + $0x68] sm:$0xff]  ;;  %v681_v44 = vld [vmem:[%s2001_s2 + $0x60] sm:$0xff]  ;;  %v1371_v45 = vld [vmem:[%s2000_s0 + $0x30] ss:$8 sps:$4 sm:$0xff]  }
  0x10   :  { %1209 = vmatprep.subr.bf16.mxu0 %v1341_v9  ;;  %1317 = vmatprep.subr.bf16.mxu1 %v1341_v9  ;;  %v1372_v46 = vld [vmem:[%s2000_s0 + $0xb0] ss:$8 sps:$4 sm:$0xff]   ;;  %v1373_v47 = vld [vmem:[%s2000_s0 + $0x44] ss:$8 sps:$4 sm:$0xff]   ;;  %v1377_v53 = vld [vmem:[%s2000_s0 + $0x40] ss:$8 sps:$4 sm:$0xff]  }
  0x11   :  { %728 = vperm.xlu1 %1332, %v674_v28   ;;  %v1375_v48 = vld [vmem:[%s2000_s0 + $0xc4] ss:$8 sps:$4 sm:$0xff]   ;;  %v684_v49 = vld [vmem:[%s2001_s2 + $0x78] sm:$0xff]  ;;  %v683_v50 = vld [vmem:[%s2001_s2 + $0x70] sm:$0xff] }
  0x12   :  { %723 = vperm.xlu0 %1331, %v673_v29   ;;  %v686_v51 = vld [vmem:[%s2001_s2 + $0x88] sm:$0xff]  ;;  %v685_v52 = vld [vmem:[%s2001_s2 + $0x80] sm:$0xff]  ;;  %v1379_v55 = vld [vmem:[%s2000_s0 + $0x54] ss:$8 sps:$4 sm:$0xff]  }
  0x13   :  { %1210 = vmatpush3.bf16.msra.mxu0 %v1342_v10  ;;  %1325 = vmatpush3.bf16.msra.mxu1 %v1342_v10  ;;  %v1378_v54 = vld [vmem:[%s2000_s0 + $0xc0] ss:$8 sps:$4 sm:$0xff]   ;;  %v1381_v56 = vld [vmem:[%s2000_s0 + $0xd4] ss:$8 sps:$4 sm:$0xff]   ;;  %v1383_v61 = vld [vmem:[%s2000_s0 + $0x50] ss:$8 sps:$4 sm:$0xff]  }
  0x14   :  { %1211 = vmatprep.subr.bf16.mxu0 %v1343_v11  ;;  %1318 = vmatprep.subr.bf16.mxu1 %v1343_v11  ;;  %v688_v57 = vld [vmem:[%s2001_s2 + $0x98] sm:$0xff]  ;;  %v687_v58 = vld [vmem:[%s2001_s2 + $0x90] sm:$0xff]  ;;  %v690_v59 = vld [vmem:[%s2001_s2 + $0xa8] sm:$0xff] }
  0x15   :  { %738 = vperm.xlu1 %1332, %v676_v33   ;;  %v689_v60 = vld [vmem:[%s2001_s2 + $0xa0] sm:$0xff]  ;;  %v1384_v62 = vld [vmem:[%s2000_s0 + $0xd0] ss:$8 sps:$4 sm:$0xff]   ;;  %v694_v3 = vld [vmem:[%s2001_s2 + $0xc8] sm:$0xff] }
  0x16   :  { %733 = vperm.xlu0 %1331, %v675_v34   ;;  %v1385_v63 = vld [vmem:[%s2000_s0 + $0x64] ss:$8 sps:$4 sm:$0xff]   ;;  %v692_v1 = vld [vmem:[%s2001_s2 + $0xb8] sm:$0xff]  ;;  %v691_v2 = vld [vmem:[%s2001_s2 + $0xb0] sm:$0xff] }
  0x17   :  { %1212 = vmatpush3.bf16.msra.mxu0 %v1344_v14  ;;  %1326 = vmatpush3.bf16.msra.mxu1 %v1344_v14  ;;  %v1387_v0 = vld [vmem:[%s2000_s0 + $0xe4] ss:$8 sps:$4 sm:$0xff]   ;;  %v1389_v5 = vld [vmem:[%s2000_s0 + $0x60] ss:$8 sps:$4 sm:$0xff]   ;;  %v1391_v7 = vld [vmem:[%s2000_s0 + $0x74] ss:$8 sps:$4 sm:$0xff]  }
  0x18   :  { %1213 = vmatprep.subr.bf16.mxu0 %v1345_v15  ;;  %1319 = vmatprep.subr.bf16.mxu1 %v1345_v15  ;;  %v693_v4 = vld [vmem:[%s2001_s2 + $0xc0] sm:$0xff]  ;;  %v1393_v8 = vld [vmem:[%s2000_s0 + $0xf4] ss:$8 sps:$4 sm:$0xff]   ;;  %v698_v11 = vld [vmem:[%s2001_s2 + $0xe8] sm:$0xff] }
  0x19   :  { %748 = vperm.xlu1 %1332, %v678_v35   ;;  %v1390_v6 = vld [vmem:[%s2000_s0 + $0xe0] ss:$8 sps:$4 sm:$0xff]   ;;  %v696_v9 = vld [vmem:[%s2001_s2 + $0xd8] sm:$0xff]  ;;  %v695_v10 = vld [vmem:[%s2001_s2 + $0xd0] sm:$0xff] }
  0x1a   :  { %743 = vperm.xlu0 %1331, %v677_v36   ;;  %v697_v12 = vld [vmem:[%s2001_s2 + $0xe0] sm:$0xff]  ;;  %v1395_v13 = vld [vmem:[%s2000_s0 + $0x70] ss:$8 sps:$4 sm:$0xff]  }
  0x1b   :  { %1214 = vmatpush3.bf16.msra.mxu0 %v1346_v16  ;;  %1327 = vmatpush3.bf16.msra.mxu1 %v1346_v16  ;;  %v1396_v14 = vld [vmem:[%s2000_s0 + $0xf0] ss:$8 sps:$4 sm:$0xff]  }
  0x1c   :  { %1215 = vmatprep.subr.bf16.mxu0 %v1347_v17  ;;  %1320 = vmatprep.subr.bf16.mxu1 %v1347_v17  ;;  %v700_v15 = vld [vmem:[%s2001_s2 + $0xf8] sm:$0xff]  ;;  %v699_v16 = vld [vmem:[%s2001_s2 + $0xf0] sm:$0xff] }
  0x1d   :  { %758 = vperm.xlu1 %1332, %v680_v41   ;;  %v989_v41 = vld [vmem:[%s2002_s3] sm:$0xff] }
  0x1e   :  { %753 = vperm.xlu0 %1331, %v679_v42  }
  0x1f   :  { %1216 = vmatpush3.bf16.msra.mxu0 %v1348_v18  ;;  %1328 = vmatpush3.bf16.msra.mxu1 %v1348_v18 }
  0x21   :  { %768 = vperm.xlu1 %1332, %v682_v43  }
  0x22   :  { %442 = vmatmul.mubr.bf16.vlgmr.msra.gmra.mrb[0].mxu0 %v1349_v19  ;;  %506 = vmatmul.mubr.bf16.vlgmr.msra.gmra.mrb[0].mxu1 %v1352_v22 }
  0x23   :  { %449 = vmatprep.mubr.bf16.mxu0 %v1355_v23  ;;  %513 = vmatprep.mubr.bf16.mxu1 %v1357_v24 }
  0x24   :  { %763 = vperm.xlu0 %1331, %v681_v44   ;;  %v1021_v44 = vld [vmem:[%s2003_s4] sm:$0xff] }
  0x25   :  { %778 = vperm.xlu1 %1332, %v684_v49  }
  0x28   :  { %773 = vperm.xlu0 %1331, %v683_v50  }
  0x29   :  { %788 = vperm.xlu1 %1332, %v686_v51  }
  0x2a   :  { %450 = vmatmul.mubr.bf16.gmra.mrb[4].mxu0 %v1359_v27  ;;  %514 = vmatmul.mubr.bf16.gmra.mrb[4].mxu1 %v1360_v30 }
  0x2b   :  { %457 = vmatprep.mubr.bf16.mxu0 %v1361_v31  ;;  %521 = vmatprep.mubr.bf16.mxu1 %v1363_v32 }
  0x2c   :  { %783 = vperm.xlu0 %1331, %v685_v52   ;;  %v990_v52 = vld [vmem:[%s2002_s3 + $0x8] sm:$0xff] }
  0x2d   :  { %798 = vperm.xlu1 %1332, %v688_v57   ;;  %v1038_v57 = vld [vmem:[%s2003_s4 + $0x88] sm:$0xff] }
  0x30   :  { %793 = vperm.xlu0 %1331, %v687_v58  }
  0x31   :  { %808 = vperm.xlu1 %1332, %v690_v59  }
  0x32   :  { %458 = vmatmul.mubr.bf16.gmra.mrb[8].mxu0 %v1365_v37  ;;  %522 = vmatmul.mubr.bf16.gmra.mrb[8].mxu1 %v1366_v38 }
  0x33   :  { %465 = vmatprep.mubr.bf16.mxu0 %v1367_v39  ;;  %529 = vmatprep.mubr.bf16.mxu1 %v1369_v40 }
  0x34   :  { %803 = vperm.xlu0 %1331, %v689_v60  }
  0x35   :  { %818 = vperm.xlu1 %1332, %v692_v1  }
  0x38   :  { %813 = vperm.xlu0 %1331, %v691_v2  }
  0x39   :  { %828 = vperm.xlu1 %1332, %v694_v3  }
  0x3a   :  { %466 = vmatmul.mubr.bf16.gmra.mrb[12].mxu0 %v1371_v45  ;;  %530 = vmatmul.mubr.bf16.gmra.mrb[12].mxu1 %v1372_v46  ;;  %v1005_v45 = vld [vmem:[%s2002_s3 + $0x80] sm:$0xff] }
  0x3b   :  { %473 = vmatprep.mubr.bf16.mxu0 %v1373_v47  ;;  %537 = vmatprep.mubr.bf16.mxu1 %v1375_v48  ;;  %v1037_v46 = vld [vmem:[%s2003_s4 + $0x80] sm:$0xff] }
  0x3c   :  { %823 = vperm.xlu0 %1331, %v693_v4  }
  0x3d   :  { %838 = vperm.xlu1 %1332, %v696_v9  }
  0x40   :  { %833 = vperm.xlu0 %1331, %v695_v10   ;;  %v991_v10 = vld [vmem:[%s2002_s3 + $0x10] sm:$0xff] }
  0x41   :  { %848 = vperm.xlu1 %1332, %v698_v11  }
  0x42   :  { %474 = vmatmul.mubr.bf16.gmra.mrb[16].mxu0 %v1377_v53  ;;  %538 = vmatmul.mubr.bf16.gmra.mrb[16].mxu1 %v1378_v54  ;;  %v1053_v53 = vadd.f32 %v1021_v44, %v989_v41  ;;  %v1069_v54 = vadd.f32 %v1037_v46, %v1005_v45  ;;  %v1024_v41 = vld [vmem:[%s2003_s4 + $0x18] sm:$0xff] }
  0x43   :  { %481 = vmatprep.mubr.bf16.mxu0 %v1379_v55  ;;  %545 = vmatprep.mubr.bf16.mxu1 %v1381_v56  ;;  %v1022_v55 = vld [vmem:[%s2003_s4 + $0x8] sm:$0xff] }
  0x44   :  { %843 = vperm.xlu0 %1331, %v697_v12   ;;  %v1006_v56 = vld [vmem:[%s2002_s3 + $0x88] sm:$0xff]  ;;  %v1054_v3 = vadd.f32 %v1022_v55, %v990_v52 }
  0x45   :  { %858 = vperm.xlu1 %1332, %v700_v15   ;;  %v1070_v4 = vadd.f32 %v1038_v57, %v1006_v56  ;;  %v1023_v15 = vld [vmem:[%s2003_s4 + $0x10] sm:$0xff] }
  0x48   :  { %853 = vperm.xlu0 %1331, %v699_v16  }
  0x4a   :  { %482 = vmatmul.mubr.bf16.gmra.mrb[20].mxu0 %v1383_v61  ;;  %546 = vmatmul.mubr.bf16.gmra.mrb[20].mxu1 %v1384_v62 }
  0x4b   :  { %489 = vmatprep.mubr.bf16.mxu0 %v1385_v63  ;;  %553 = vmatprep.mubr.bf16.mxu1 %v1387_v0 }
  0x52   :  { %490 = vmatmul.mubr.bf16.gmra.mrb[24].mxu0 %v1389_v5  ;;  %554 = vmatmul.mubr.bf16.gmra.mrb[24].mxu1 %v1390_v6 }
  0x53   :  { %497 = vmatprep.mubr.bf16.mxu0 %v1391_v7  ;;  %561 = vmatprep.mubr.bf16.mxu1 %v1393_v8 }
  0x5a   :  { %498 = vmatmul.mubr.bf16.gmra.mrb[28].mxu0 %v1395_v13  ;;  %562 = vmatmul.mubr.bf16.gmra.mrb[28].mxu1 %v1396_v14 }
  0x88   :  { %v1668_v17 = vpop.permute.xlu1 %713 }
  0x89   :  { %v704_v18 = vpop.permute.xlu0 %703 }
  0x8c   :  { %v1670_v19 = vpop.permute.xlu1 %718 }
  0x8d   :  { %v709_v20 = vpop.permute.xlu0 %708 }
  0x90   :  { %v1672_v21 = vpop.permute.xlu1 %728 }
  0x91   :  { %v1674_v22 = vpop.permute.xlu0 %723 }
  0x94   :  { %v1676_v23 = vpop.permute.xlu1 %738 }
  0x95   :  { %v1678_v24 = vpop.permute.xlu0 %733 }
  0x98   :  { %v1680_v25 = vpop.permute.xlu1 %748 }
  0x99   :  { %v1682_v26 = vpop.permute.xlu0 %743 }
  0x9c   :  { %v1684_v27 = vpop.permute.xlu1 %758 }
  0x9d   :  { %v1686_v28 = vpop.permute.xlu0 %753 }
  0xa0   :  { %v1688_v29 = vpop.permute.xlu1 %768 }
  0xa3   :  { %v1690_v30 = vpop.permute.xlu0 %763 }
  0xa4   :  { %v1692_v31 = vpop.permute.xlu1 %778 }
  0xa7   :  { %v1694_v32 = vpop.permute.xlu0 %773 }
  0xa8   :  { %v789_v58 = vpop.permute.xlu1 %788 }
  0xab   :  { %v784_v49 = vpop.permute.xlu0 %783 }
  0xac   :  { %v799_v44 = vpop.permute.xlu1 %798 }
  0xaf   :  { %v794_v45 = vpop.permute.xlu0 %793 }
  0xf5   :  { %v1217_v33 = vpop.f32.mrb[0].mxu0  ;;  %v1265_v34 = vpop.f32.mrb[0].mxu1 }
  0xf6   :  { %v1218_v35 = vpop.f32.mrb[1].mxu0  ;;  %v1266_v36 = vpop.f32.mrb[1].mxu1 }
  0xf7   :  { %v1219_v37 = vadd.f32 %v1218_v35, %v1217_v33  ;;  %v1267_v38 = vadd.f32 %v1266_v36, %v1265_v34  ;;  %v1220_v39 = vpop.f32.mrb[2].mxu0  ;;  %v1268_v40 = vpop.f32.mrb[2].mxu1  ;;  %v1007_v34 = vld [vmem:[%s2002_s3 + $0x90] sm:$0xff] }
  0xf8   :  { %v1221_v42 = vpop.f32.mrb[3].mxu0  ;;  %v1269_v43 = vpop.f32.mrb[3].mxu1  ;;  %v1039_v35 = vld [vmem:[%s2003_s4 + $0x90] sm:$0xff] }
  0xf9   :  { %v1222_v47 = vadd.f32 %v1221_v42, %v1220_v39  ;;  %v1270_v48 = vadd.f32 %v1269_v43, %v1268_v40  ;;  %v861_v50 = vmul.f32 %v1219_v37, %v704_v18  ;;  %v877_v51 = vmul.f32 %v1267_v38, %v784_v49  ;;  %v992_v37 = vld [vmem:[%s2002_s3 + $0x18] sm:$0xff] }
  0xfa   :  { %v1008_v42 = vld [vmem:[%s2002_s3 + $0x98] sm:$0xff] }
  0xfb   :  { %vm893_vm0 = vcmp.gt.f32.partialorder %v861_v50, 0.0  ;;  %v925_v59 = vmul.f32 0.01, %v861_v50  ;;  %vm909_vm1 = vcmp.gt.f32.partialorder %v877_v51, 0.0  ;;  %v941_v60 = vmul.f32 0.01, %v877_v51 }
  0xfc   :  { %v862_v61 = vmul.f32 %v1222_v47, %v709_v20  ;;  %v878_v62 = vmul.f32 %v1270_v48, %v789_v58  ;;  %v1040_v43 = vld [vmem:[%s2003_s4 + $0x98] sm:$0xff]  ;;  %v1055_v48 = vadd.f32 %v1023_v15, %v991_v10  ;;  %v804_v15 = vpop.permute.xlu0 %803 }
  0xfd   :  { %v1223_v63 = vpop.f32.mrb[4].mxu0  ;;  %v1271_v0 = vpop.f32.mrb[4].mxu1  ;;  %v957_v1 = vsel %vm893_vm0, %v861_v50, %v925_v59  ;;  %v973_v2 = vsel %vm909_vm1, %v877_v51, %v941_v60  ;;  %v1071_v50 = vadd.f32 %v1039_v35, %v1007_v34  ;;  %v1072_v56 = vadd.f32 %v1040_v43, %v1008_v42  ;;  %v994_v34 = vld [vmem:[%s2002_s3 + $0x28] sm:$0xff] }
  0xfe   :  { %v1224_v5 = vpop.f32.mrb[5].mxu0  ;;  %v1272_v6 = vpop.f32.mrb[5].mxu1  ;;  %v1085_v7 = vadd.f32 %v1053_v53, %v957_v1  ;;  %v1101_v8 = vadd.f32 %v1069_v54, %v973_v2  ;;  %vm894_vm2 = vcmp.gt.f32.partialorder %v862_v61, 0.0  ;;  %v926_v9 = vmul.f32 0.01, %v862_v61 }
  0xff   :  { %v1226_v11 = vpop.f32.mrb[6].mxu0  ;;  %v1274_v12 = vpop.f32.mrb[6].mxu1  ;;  %vm910_vm3 = vcmp.gt.f32.partialorder %v878_v62, 0.0  ;;  %v942_v13 = vmul.f32 0.01, %v878_v62  ;;  %v1225_v14 = vadd.f32 %v1224_v5, %v1223_v63  ;;  %v1273_v16 = vadd.f32 %v1272_v6, %v1271_v0 }
 0x100   :  { %v1227_v18 = vpop.f32.mrb[7].mxu0  ;;  %v1275_v20 = vpop.f32.mrb[7].mxu1  ;;  %1117 = vst [vmem:[%s2004_s5] sm:$0xff] %v1085_v7  ;;  %1133 = vst [vmem:[%s2004_s5 + $0x80] sm:$0xff] %v1101_v8  ;;  %v958_v33 = vsel %vm894_vm2, %v862_v61, %v926_v9  ;;  %v1056_v54 = vadd.f32 %v1024_v41, %v992_v37  ;;  %v993_v7 = vld [vmem:[%s2002_s3 + $0x20] sm:$0xff] }
 0x101   :  { %v1228_v36 = vadd.f32 %v1227_v18, %v1226_v11  ;;  %v1276_v38 = vadd.f32 %v1275_v20, %v1274_v12  ;;  %v1086_v39 = vadd.f32 %v1054_v3, %v958_v33  ;;  %v974_v40 = vsel %vm910_vm3, %v878_v62, %v942_v13  ;;  %v1025_v12 = vld [vmem:[%s2003_s4 + $0x20] sm:$0xff]  ;;  %v809_v43 = vpop.permute.xlu1 %808 }
 0x102   :  { %v1102_v46 = vadd.f32 %v1070_v4, %v974_v40  ;;  %v863_v47 = vmul.f32 %v1225_v14, %v1668_v17  ;;  %v879_v49 = vmul.f32 %v1273_v16, %v794_v45  ;;  %v1009_v13 = vld [vmem:[%s2002_s3 + $0xa0] sm:$0xff]  ;;  %v1057_v37 = vadd.f32 %v1025_v12, %v993_v7  ;;  %v1010_v40 = vld [vmem:[%s2002_s3 + $0xa8] sm:$0xff] }
 0x103   :  { %1118 = vst [vmem:[%s2004_s5 + $0x8] sm:$0xff] %v1086_v39  ;;  %v864_v53 = vmul.f32 %v1228_v36, %v1670_v19  ;;  %v880_v55 = vmul.f32 %v1276_v38, %v799_v44  ;;  %v1041_v14 = vld [vmem:[%s2003_s4 + $0xa0] sm:$0xff]  ;;  %v1026_v39 = vld [vmem:[%s2003_s4 + $0x28] sm:$0xff] }
 0x104   :  { %1134 = vst [vmem:[%s2004_s5 + $0x88] sm:$0xff] %v1102_v46  ;;  %vm895_vm4 = vcmp.gt.f32.partialorder %v863_v47, 0.0  ;;  %v927_v59 = vmul.f32 0.01, %v863_v47  ;;  %vm911_vm5 = vcmp.gt.f32.partialorder %v879_v49, 0.0  ;;  %v1073_v38 = vadd.f32 %v1041_v14, %v1009_v13  ;;  %v1028_v13 = vld [vmem:[%s2003_s4 + $0x38] sm:$0xff] }
 0x105   :  { %v1229_v51 = vpop.f32.mrb[8].mxu0  ;;  %v1277_v52 = vpop.f32.mrb[8].mxu1  ;;  %v943_v17 = vmul.f32 0.01, %v879_v49  ;;  %vm896_vm6 = vcmp.gt.f32.partialorder %v864_v53, 0.0  ;;  %vm912_vm7 = vcmp.gt.f32.partialorder %v880_v55, 0.0 }
 0x106   :  { %v1230_v57 = vpop.f32.mrb[9].mxu0  ;;  %v1278_v58 = vpop.f32.mrb[9].mxu1  ;;  %v928_v60 = vmul.f32 0.01, %v864_v53  ;;  %v944_v61 = vmul.f32 0.01, %v880_v55  ;;  %v959_v62 = vsel %vm895_vm4, %v863_v47, %v927_v59 }
 0x107   :  { %v975_v63 = vsel %vm911_vm5, %v879_v49, %v943_v17  ;;  %v1231_v0 = vadd.f32 %v1230_v57, %v1229_v51  ;;  %v1279_v1 = vadd.f32 %v1278_v58, %v1277_v52  ;;  %v1232_v2 = vpop.f32.mrb[10].mxu0  ;;  %v1280_v3 = vpop.f32.mrb[10].mxu1  ;;  %v1087_v19 = vadd.f32 %v1055_v48, %v959_v62  ;;  %v1027_v57 = vld [vmem:[%s2003_s4 + $0x30] sm:$0xff]  ;;  %v1012_v14 = vld [vmem:[%s2002_s3 + $0xb8] sm:$0xff] }
 0x108   :  { %v1103_v4 = vadd.f32 %v1071_v50, %v975_v63  ;;  %v960_v5 = vsel %vm896_vm6, %v864_v53, %v928_v60  ;;  %v976_v6 = vsel %vm912_vm7, %v880_v55, %v944_v61  ;;  %v1233_v8 = vpop.f32.mrb[11].mxu0  ;;  %v1281_v9 = vpop.f32.mrb[11].mxu1  ;;  %v1011_v62 = vld [vmem:[%s2002_s3 + $0xb0] sm:$0xff] }
 0x109   :  { %v1088_v10 = vadd.f32 %v1056_v54, %v960_v5  ;;  %v1104_v11 = vadd.f32 %v1072_v56, %v976_v6  ;;  %1119 = vst [vmem:[%s2004_s5 + $0x10] sm:$0xff] %v1087_v19  ;;  %v1234_v16 = vadd.f32 %v1233_v8, %v1232_v2  ;;  %v1282_v18 = vadd.f32 %v1281_v9, %v1280_v3  ;;  %v995_v56 = vld [vmem:[%s2002_s3 + $0x30] sm:$0xff]  ;;  %v996_v8 = vld [vmem:[%s2002_s3 + $0x38] sm:$0xff] }
 0x10a   :  { %1135 = vst [vmem:[%s2004_s5 + $0x90] sm:$0xff] %v1103_v4  ;;  %v865_v20 = vmul.f32 %v1231_v0, %v1674_v22  ;;  %v881_v33 = vmul.f32 %v1279_v1, %v804_v15  ;;  %v1042_v22 = vld [vmem:[%s2003_s4 + $0xa8] sm:$0xff]  ;;  %v1058_v54 = vadd.f32 %v1026_v39, %v994_v34  ;;  %v1043_v63 = vld [vmem:[%s2003_s4 + $0xb0] sm:$0xff]  ;;  %v814_v0 = vpop.permute.xlu0 %813  ;;  %v1059_v2 = vadd.f32 %v1027_v57, %v995_v56 }
 0x10b   :  { %1120 = vst [vmem:[%s2004_s5 + $0x18] sm:$0xff] %v1088_v10  ;;  %1136 = vst [vmem:[%s2004_s5 + $0x98] sm:$0xff] %v1104_v11  ;;  %v866_v46 = vmul.f32 %v1234_v16, %v1672_v21  ;;  %v882_v47 = vmul.f32 %v1282_v18, %v809_v43  ;;  %v1074_v55 = vadd.f32 %v1042_v22, %v1010_v40  ;;  %v819_v18 = vpop.permute.xlu1 %818  ;;  %v997_v43 = vld [vmem:[%s2002_s3 + $0x40] sm:$0xff] }
 0x10c   :  { %vm897_vm8 = vcmp.gt.f32.partialorder %v865_v20, 0.0  ;;  %v929_v44 = vmul.f32 0.01, %v865_v20  ;;  %vm913_vm9 = vcmp.gt.f32.partialorder %v881_v33, 0.0  ;;  %v945_v45 = vmul.f32 0.01, %v881_v33 }
 0x10d   :  { %v1235_v35 = vpop.f32.mrb[12].mxu0  ;;  %v1283_v36 = vpop.f32.mrb[12].mxu1  ;;  %vm898_vm10 = vcmp.gt.f32.partialorder %v866_v46, 0.0  ;;  %v930_v60 = vmul.f32 0.01, %v866_v46  ;;  %vm914_vm11 = vcmp.gt.f32.partialorder %v882_v47, 0.0  ;;  %v1075_v12 = vadd.f32 %v1043_v63, %v1011_v62 }
 0x10e   :  { %v1236_v41 = vpop.f32.mrb[13].mxu0  ;;  %v1284_v42 = vpop.f32.mrb[13].mxu1  ;;  %v961_v52 = vsel %vm897_vm8, %v865_v20, %v929_v44  ;;  %v977_v53 = vsel %vm913_vm9, %v881_v33, %v945_v45  ;;  %v946_v61 = vmul.f32 0.01, %v882_v47  ;;  %v1029_v44 = vld [vmem:[%s2003_s4 + $0x40] sm:$0xff] }
 0x10f   :  { %v1237_v48 = vadd.f32 %v1236_v41, %v1235_v35  ;;  %v1285_v49 = vadd.f32 %v1284_v42, %v1283_v36  ;;  %v1238_v50 = vpop.f32.mrb[14].mxu0  ;;  %v1286_v51 = vpop.f32.mrb[14].mxu1  ;;  %v1089_v21 = vadd.f32 %v1057_v37, %v961_v52  ;;  %v1105_v17 = vadd.f32 %v1073_v38, %v977_v53 }
 0x110   :  { %v1239_v58 = vpop.f32.mrb[15].mxu0  ;;  %v1287_v59 = vpop.f32.mrb[15].mxu1  ;;  %v962_v1 = vsel %vm898_vm10, %v866_v46, %v930_v60  ;;  %v978_v5 = vsel %vm914_vm11, %v882_v47, %v946_v61  ;;  %v1060_v41 = vadd.f32 %v1028_v13, %v996_v8 }
 0x111   :  { %1121 = vst [vmem:[%s2004_s5 + $0x20] sm:$0xff] %v1089_v21  ;;  %1137 = vst [vmem:[%s2004_s5 + $0xa0] sm:$0xff] %v1105_v17  ;;  %v1240_v3 = vadd.f32 %v1239_v58, %v1238_v50  ;;  %v1288_v19 = vadd.f32 %v1287_v59, %v1286_v51  ;;  %v1090_v4 = vadd.f32 %v1058_v54, %v962_v1  ;;  %v1013_v50 = vld [vmem:[%s2002_s3 + $0xc0] sm:$0xff]  ;;  %v824_v52 = vpop.permute.xlu0 %823  ;;  %v998_v17 = vld [vmem:[%s2002_s3 + $0x48] sm:$0xff] }
 0x112   :  { %v867_v6 = vmul.f32 %v1237_v48, %v1678_v24  ;;  %v883_v7 = vmul.f32 %v1285_v49, %v814_v0  ;;  %v1106_v11 = vadd.f32 %v1074_v55, %v978_v5  ;;  %v1044_v24 = vld [vmem:[%s2003_s4 + $0xb8] sm:$0xff]  ;;  %v1045_v51 = vld [vmem:[%s2003_s4 + $0xc0] sm:$0xff]  ;;  %v1061_v54 = vadd.f32 %v1029_v44, %v997_v43  ;;  %v1030_v0 = vld [vmem:[%s2003_s4 + $0x48] sm:$0xff] }
 0x113   :  { %1122 = vst [vmem:[%s2004_s5 + $0x28] sm:$0xff] %v1090_v4  ;;  %v868_v34 = vmul.f32 %v1240_v3, %v1676_v23  ;;  %v884_v35 = vmul.f32 %v1288_v19, %v819_v18  ;;  %v1076_v42 = vadd.f32 %v1044_v24, %v1012_v14  ;;  %v1077_v63 = vadd.f32 %v1045_v51, %v1013_v50  ;;  %v1014_v1 = vld [vmem:[%s2002_s3 + $0xc8] sm:$0xff]  ;;  %v829_v19 = vpop.permute.xlu1 %828  ;;  %v1032_v50 = vld [vmem:[%s2003_s4 + $0x58] sm:$0xff] }
 0x114   :  { %vm899_vm12 = vcmp.gt.f32.partialorder %v867_v6, 0.0  ;;  %v931_v20 = vmul.f32 0.01, %v867_v6  ;;  %vm915_vm13 = vcmp.gt.f32.partialorder %v883_v7, 0.0  ;;  %v947_v33 = vmul.f32 0.01, %v883_v7 }
 0x115   :  { %v1241_v9 = vpop.f32.mrb[16].mxu0  ;;  %v1289_v10 = vpop.f32.mrb[16].mxu1  ;;  %1138 = vst [vmem:[%s2004_s5 + $0xa8] sm:$0xff] %v1106_v11  ;;  %vm900_vm14 = vcmp.gt.f32.partialorder %v868_v34, 0.0  ;;  %v932_v48 = vmul.f32 0.01, %v868_v34  ;;  %v1062_v14 = vadd.f32 %v1030_v0, %v998_v17 }
 0x116   :  { %v1242_v15 = vpop.f32.mrb[17].mxu0  ;;  %v1290_v16 = vpop.f32.mrb[17].mxu1  ;;  %v963_v40 = vsel %vm899_vm12, %v867_v6, %v931_v20  ;;  %v979_v22 = vsel %vm915_vm13, %v883_v7, %v947_v33  ;;  %vm916_vm15 = vcmp.gt.f32.partialorder %v884_v35, 0.0  ;;  %v948_v49 = vmul.f32 0.01, %v884_v35  ;;  %v1016_v51 = vld [vmem:[%s2002_s3 + $0xd8] sm:$0xff] }
 0x117   :  { %v1243_v36 = vadd.f32 %v1242_v15, %v1241_v9  ;;  %v1291_v37 = vadd.f32 %v1290_v16, %v1289_v10  ;;  %v1244_v38 = vpop.f32.mrb[18].mxu0  ;;  %v1292_v39 = vpop.f32.mrb[18].mxu1  ;;  %v1091_v23 = vadd.f32 %v1059_v2, %v963_v40  ;;  %v1107_v47 = vadd.f32 %v1075_v12, %v979_v22  ;;  %v999_v15 = vld [vmem:[%s2002_s3 + $0x50] sm:$0xff] }
 0x118   :  { %v1245_v45 = vpop.f32.mrb[19].mxu0  ;;  %v1293_v46 = vpop.f32.mrb[19].mxu1  ;;  %v964_v53 = vsel %vm900_vm14, %v868_v34, %v932_v48  ;;  %v980_v58 = vsel %vm916_vm15, %v884_v35, %v948_v49  ;;  %v1031_v16 = vld [vmem:[%s2003_s4 + $0x50] sm:$0xff] }
 0x119   :  { %1123 = vst [vmem:[%s2004_s5 + $0x30] sm:$0xff] %v1091_v23  ;;  %1139 = vst [vmem:[%s2004_s5 + $0xb0] sm:$0xff] %v1107_v47  ;;  %v1246_v55 = vadd.f32 %v1245_v45, %v1244_v38  ;;  %v1294_v56 = vadd.f32 %v1293_v46, %v1292_v39  ;;  %v1092_v57 = vadd.f32 %v1060_v41, %v964_v53  ;;  %v834_v38 = vpop.permute.xlu0 %833  ;;  %v1000_v46 = vld [vmem:[%s2002_s3 + $0x58] sm:$0xff] }
 0x11a   :  { %v869_v59 = vmul.f32 %v1243_v36, %v1682_v26  ;;  %v885_v21 = vmul.f32 %v1291_v37, %v824_v52  ;;  %v1108_v62 = vadd.f32 %v1076_v42, %v980_v58  ;;  %v1046_v26 = vld [vmem:[%s2003_s4 + $0xc8] sm:$0xff]  ;;  %v1015_v36 = vld [vmem:[%s2002_s3 + $0xd0] sm:$0xff]  ;;  %v1063_v40 = vadd.f32 %v1031_v16, %v999_v15 }
 0x11b   :  { %1124 = vst [vmem:[%s2004_s5 + $0x38] sm:$0xff] %v1092_v57  ;;  %v870_v6 = vmul.f32 %v1246_v55, %v1680_v25  ;;  %v886_v7 = vmul.f32 %v1294_v56, %v829_v19  ;;  %v1078_v24 = vadd.f32 %v1046_v26, %v1014_v1  ;;  %v1047_v37 = vld [vmem:[%s2003_s4 + $0xd0] sm:$0xff]  ;;  %v1001_v1 = vld [vmem:[%s2002_s3 + $0x60] sm:$0xff]  ;;  %v1002_v16 = vld [vmem:[%s2002_s3 + $0x68] sm:$0xff] }
 0x11c   :  { %vm901_vm0 = vcmp.gt.f32.partialorder %v869_v59, 0.0  ;;  %v933_v4 = vmul.f32 0.01, %v869_v59  ;;  %vm917_vm1 = vcmp.gt.f32.partialorder %v885_v21, 0.0  ;;  %v949_v5 = vmul.f32 0.01, %v885_v21 }
 0x11d   :  { %v1247_v60 = vpop.f32.mrb[20].mxu0  ;;  %v1295_v61 = vpop.f32.mrb[20].mxu1  ;;  %1140 = vst [vmem:[%s2004_s5 + $0xb8] sm:$0xff] %v1108_v62  ;;  %vm902_vm2 = vcmp.gt.f32.partialorder %v870_v6, 0.0  ;;  %v934_v34 = vmul.f32 0.01, %v870_v6  ;;  %v1079_v49 = vadd.f32 %v1047_v37, %v1015_v36 }
 0x11e   :  { %v1248_v2 = vpop.f32.mrb[21].mxu0  ;;  %v1296_v3 = vpop.f32.mrb[21].mxu1  ;;  %v965_v12 = vsel %vm901_vm0, %v869_v59, %v933_v4  ;;  %v981_v13 = vsel %vm917_vm1, %v885_v21, %v949_v5  ;;  %vm918_vm3 = vcmp.gt.f32.partialorder %v886_v7, 0.0  ;;  %v950_v35 = vmul.f32 0.01, %v886_v7  ;;  %v1033_v26 = vld [vmem:[%s2003_s4 + $0x60] sm:$0xff] }
 0x11f   :  { %v1249_v8 = vadd.f32 %v1248_v2, %v1247_v60  ;;  %v1297_v9 = vadd.f32 %v1296_v3, %v1295_v61  ;;  %v1250_v10 = vpop.f32.mrb[22].mxu0  ;;  %v1298_v11 = vpop.f32.mrb[22].mxu1  ;;  %v1093_v25 = vadd.f32 %v1061_v54, %v965_v12  ;;  %v1109_v33 = vadd.f32 %v1077_v63, %v981_v13 }
 0x120   :  { %v1251_v18 = vpop.f32.mrb[23].mxu0  ;;  %v1299_v20 = vpop.f32.mrb[23].mxu1  ;;  %v966_v39 = vsel %vm902_vm2, %v870_v6, %v934_v34  ;;  %v982_v43 = vsel %vm918_vm3, %v886_v7, %v950_v35  ;;  %v1064_v63 = vadd.f32 %v1032_v50, %v1000_v46  ;;  %v1017_v6 = vld [vmem:[%s2002_s3 + $0xe0] sm:$0xff]  ;;  %v1034_v34 = vld [vmem:[%s2003_s4 + $0x68] sm:$0xff]  ;;  %v1035_v50 = vld [vmem:[%s2003_s4 + $0x70] sm:$0xff] }
 0x121   :  { %1125 = vst [vmem:[%s2004_s5 + $0x40] sm:$0xff] %v1093_v25  ;;  %1141 = vst [vmem:[%s2004_s5 + $0xc0] sm:$0xff] %v1109_v33  ;;  %v1252_v22 = vadd.f32 %v1251_v18, %v1250_v10  ;;  %v1300_v41 = vadd.f32 %v1299_v20, %v1298_v11  ;;  %v1094_v42 = vadd.f32 %v1062_v14, %v966_v39  ;;  %v839_v54 = vpop.permute.xlu1 %838  ;;  %v1049_v7 = vld [vmem:[%s2003_s4 + $0xe0] sm:$0xff]  ;;  %v1018_v35 = vld [vmem:[%s2002_s3 + $0xe8] sm:$0xff] }
 0x122   :  { %v871_v44 = vmul.f32 %v1249_v8, %v1686_v28  ;;  %v887_v45 = vmul.f32 %v1297_v9, %v834_v38  ;;  %v1110_v48 = vadd.f32 %v1078_v24, %v982_v43  ;;  %v1048_v28 = vld [vmem:[%s2003_s4 + $0xd8] sm:$0xff]  ;;  %v844_v8 = vpop.permute.xlu0 %843  ;;  %v1065_v10 = vadd.f32 %v1033_v26, %v1001_v1 }
 0x123   :  { %1126 = vst [vmem:[%s2004_s5 + $0x48] sm:$0xff] %v1094_v42  ;;  %v872_v57 = vmul.f32 %v1252_v22, %v1684_v27  ;;  %v888_v58 = vmul.f32 %v1300_v41, %v839_v54  ;;  %v1080_v0 = vadd.f32 %v1048_v28, %v1016_v51  ;;  %v1081_v33 = vadd.f32 %v1049_v7, %v1017_v6 }
 0x124   :  { %vm903_vm4 = vcmp.gt.f32.partialorder %v871_v44, 0.0  ;;  %v935_v55 = vmul.f32 0.01, %v871_v44  ;;  %vm919_vm5 = vcmp.gt.f32.partialorder %v887_v45, 0.0  ;;  %v951_v56 = vmul.f32 0.01, %v887_v45 }
 0x125   :  { %v1253_v23 = vpop.f32.mrb[24].mxu0  ;;  %v1301_v47 = vpop.f32.mrb[24].mxu1  ;;  %1142 = vst [vmem:[%s2004_s5 + $0xc8] sm:$0xff] %v1110_v48  ;;  %vm904_vm6 = vcmp.gt.f32.partialorder %v872_v57, 0.0  ;;  %v936_v4 = vmul.f32 0.01, %v872_v57 }
 0x126   :  { %v1254_v52 = vpop.f32.mrb[25].mxu0  ;;  %v1302_v53 = vpop.f32.mrb[25].mxu1  ;;  %v967_v61 = vsel %vm903_vm4, %v871_v44, %v935_v55  ;;  %v983_v62 = vsel %vm919_vm5, %v887_v45, %v951_v56  ;;  %vm920_vm7 = vcmp.gt.f32.partialorder %v888_v58, 0.0  ;;  %v952_v5 = vmul.f32 0.01, %v888_v58  ;;  %v1019_v55 = vld [vmem:[%s2002_s3 + $0xf0] sm:$0xff] }
 0x127   :  { %v1255_v59 = vadd.f32 %v1254_v52, %v1253_v23  ;;  %v1303_v21 = vadd.f32 %v1302_v53, %v1301_v47  ;;  %v1256_v17 = vpop.f32.mrb[26].mxu0  ;;  %v1304_v60 = vpop.f32.mrb[26].mxu1  ;;  %v1095_v27 = vadd.f32 %v1063_v40, %v967_v61  ;;  %v1111_v19 = vadd.f32 %v1079_v49, %v983_v62  ;;  %v1003_v49 = vld [vmem:[%s2002_s3 + $0x70] sm:$0xff] }
 0x128   :  { %v1257_v2 = vpop.f32.mrb[27].mxu0  ;;  %v1305_v3 = vpop.f32.mrb[27].mxu1  ;;  %v968_v9 = vsel %vm904_vm6, %v872_v57, %v936_v4  ;;  %v984_v14 = vsel %vm920_vm7, %v888_v58, %v952_v5  ;;  %v1066_v47 = vadd.f32 %v1034_v34, %v1002_v16  ;;  %v1051_v56 = vld [vmem:[%s2003_s4 + $0xf0] sm:$0xff] }
 0x129   :  { %1127 = vst [vmem:[%s2004_s5 + $0x50] sm:$0xff] %v1095_v27  ;;  %1143 = vst [vmem:[%s2004_s5 + $0xd0] sm:$0xff] %v1111_v19  ;;  %v1258_v11 = vadd.f32 %v1257_v2, %v1256_v17  ;;  %v1306_v12 = vadd.f32 %v1305_v3, %v1304_v60  ;;  %v1096_v13 = vadd.f32 %v1064_v63, %v968_v9  ;;  %v849_v38 = vpop.permute.xlu1 %848  ;;  %v854_v57 = vpop.permute.xlu0 %853  ;;  %v1036_v2 = vld [vmem:[%s2003_s4 + $0x78] sm:$0xff] }
 0x12a   :  { %v873_v24 = vmul.f32 %v1255_v59, %v1690_v30  ;;  %v889_v15 = vmul.f32 %v1303_v21, %v844_v8  ;;  %v1112_v25 = vadd.f32 %v1080_v0, %v984_v14  ;;  %v1050_v30 = vld [vmem:[%s2003_s4 + $0xe8] sm:$0xff]  ;;  %v1067_v59 = vadd.f32 %v1035_v50, %v1003_v49  ;;  %v1004_v0 = vld [vmem:[%s2002_s3 + $0x78] sm:$0xff] }
 0x12b   :  { %1128 = vst [vmem:[%s2004_s5 + $0x58] sm:$0xff] %v1096_v13  ;;  %v874_v22 = vmul.f32 %v1258_v11, %v1688_v29  ;;  %v890_v41 = vmul.f32 %v1306_v12, %v849_v38  ;;  %v1082_v48 = vadd.f32 %v1050_v30, %v1018_v35  ;;  %v1083_v26 = vadd.f32 %v1051_v56, %v1019_v55  ;;  %v1020_v3 = vld [vmem:[%s2002_s3 + $0xf8] sm:$0xff] }
 0x12c   :  { %vm905_vm8 = vcmp.gt.f32.partialorder %v873_v24, 0.0  ;;  %v937_v39 = vmul.f32 0.01, %v873_v24  ;;  %vm921_vm9 = vcmp.gt.f32.partialorder %v889_v15, 0.0  ;;  %v953_v40 = vmul.f32 0.01, %v889_v15 }
 0x12d   :  { %v1259_v18 = vpop.f32.mrb[28].mxu0  ;;  %v1307_v20 = vpop.f32.mrb[28].mxu1  ;;  %1144 = vst [vmem:[%s2004_s5 + $0xd8] sm:$0xff] %v1112_v25  ;;  %vm906_vm10 = vcmp.gt.f32.partialorder %v874_v22, 0.0  ;;  %v938_v53 = vmul.f32 0.01, %v874_v22  ;;  %v1068_v9 = vadd.f32 %v1036_v2, %v1004_v0 }
 0x12e   :  { %v1260_v36 = vpop.f32.mrb[29].mxu0  ;;  %v1308_v37 = vpop.f32.mrb[29].mxu1  ;;  %v969_v46 = vsel %vm905_vm8, %v873_v24, %v937_v39  ;;  %v985_v23 = vsel %vm921_vm9, %v889_v15, %v953_v40  ;;  %vm922_vm11 = vcmp.gt.f32.partialorder %v890_v41, 0.0  ;;  %v954_v54 = vmul.f32 0.01, %v890_v41  ;;  %v1052_v27 = vld [vmem:[%s2003_s4 + $0xf8] sm:$0xff] }
 0x12f   :  { %v1261_v42 = vadd.f32 %v1260_v36, %v1259_v18  ;;  %v1309_v43 = vadd.f32 %v1308_v37, %v1307_v20  ;;  %v1262_v44 = vpop.f32.mrb[30].mxu0  ;;  %v1310_v45 = vpop.f32.mrb[30].mxu1  ;;  %v1097_v29 = vadd.f32 %v1065_v10, %v969_v46  ;;  %v1113_v52 = vadd.f32 %v1081_v33, %v985_v23 }
 0x130   :  { %v1263_v51 = vpop.f32.mrb[31].mxu0  ;;  %v1311_v28 = vpop.f32.mrb[31].mxu1  ;;  %v970_v58 = vsel %vm906_vm10, %v874_v22, %v938_v53  ;;  %v986_v61 = vsel %vm922_vm11, %v890_v41, %v954_v54  ;;  %v1084_v10 = vadd.f32 %v1052_v27, %v1020_v3 }
 0x131   :  { %1129 = vst [vmem:[%s2004_s5 + $0x60] sm:$0xff] %v1097_v29  ;;  %1145 = vst [vmem:[%s2004_s5 + $0xe0] sm:$0xff] %v1113_v52  ;;  %v1264_v21 = vadd.f32 %v1263_v51, %v1262_v44  ;;  %v1312_v17 = vadd.f32 %v1311_v28, %v1310_v45  ;;  %v1098_v60 = vadd.f32 %v1066_v47, %v970_v58 }
 0x132   :  { %v875_v62 = vmul.f32 %v1261_v42, %v1694_v32  ;;  %v891_v63 = vmul.f32 %v1309_v43, %v854_v57  ;;  %v1114_v1 = vadd.f32 %v1082_v48, %v986_v61  ;;  %v859_v32 = vpop.permute.xlu1 %858 }
 0x133   :  { %1130 = vst [vmem:[%s2004_s5 + $0x68] sm:$0xff] %v1098_v60  ;;  %v876_v5 = vmul.f32 %v1264_v21, %v1692_v31  ;;  %v892_v6 = vmul.f32 %v1312_v17, %v859_v32 }
 0x134   :  { %vm907_vm12 = vcmp.gt.f32.partialorder %v875_v62, 0.0  ;;  %v939_v19 = vmul.f32 0.01, %v875_v62  ;;  %vm923_vm13 = vcmp.gt.f32.partialorder %v891_v63, 0.0  ;;  %v955_v4 = vmul.f32 0.01, %v891_v63 }
 0x135   :  { %1146 = vst [vmem:[%s2004_s5 + $0xe8] sm:$0xff] %v1114_v1  ;;  %vm908_vm14 = vcmp.gt.f32.partialorder %v876_v5, 0.0  ;;  %v940_v13 = vmul.f32 0.01, %v876_v5  ;;  %vm924_vm15 = vcmp.gt.f32.partialorder %v892_v6, 0.0 }
 0x136   :  { %v971_v7 = vsel %vm907_vm12, %v875_v62, %v939_v19  ;;  %v987_v8 = vsel %vm923_vm13, %v891_v63, %v955_v4  ;;  %v956_v14 = vmul.f32 0.01, %v892_v6 }
 0x137   :  { %v1099_v11 = vadd.f32 %v1067_v59, %v971_v7  ;;  %v1115_v12 = vadd.f32 %v1083_v26, %v987_v8  ;;  %v972_v31 = vsel %vm908_vm14, %v876_v5, %v940_v13 }
 0x138   :  { %v1100_v24 = vadd.f32 %v1068_v9, %v972_v31  ;;  %v988_v15 = vsel %vm924_vm15, %v892_v6, %v956_v14 }
 0x139   :  { %1131 = vst [vmem:[%s2004_s5 + $0x70] sm:$0xff] %v1099_v11  ;;  %1147 = vst [vmem:[%s2004_s5 + $0xf0] sm:$0xff] %v1115_v12  ;;  %v1116_v16 = vadd.f32 %v1084_v10, %v988_v15 }
 0x13a   :  { %1132 = vst [vmem:[%s2004_s5 + $0x78] sm:$0xff] %v1100_v24 }
 0x13b   :  { %1148 = vst [vmem:[%s2004_s5 + $0xf8] sm:$0xff] %v1116_v16 }

</bundles_post_ra>
